<compile_context>
chip_gen: v7x
topology: tpu7x:2x2x1
jax: 0.10.0
libtpu: 0.0.40
codegen_flags: <defaults>
</compile_context>

<pallas_src>
import functools

import jax
import jax.numpy as jnp
from jax.experimental import pallas as pl
from jax.experimental.pallas import tpu as pltpu

LANE = 128
_BN_EPS = 1e-5


def _round_up(x, m):
    return ((x + m - 1) // m) * m


def _vmem_limit(need_bytes):
    # floor at 32 MiB (>= default scoped limits), cap at 48 MiB (v7x headroom)
    return int(min(max(need_bytes + (4 << 20), 32 << 20), 48 << 20))


# ----------------------------------------------------------------------------
# Kernel 1: fused 1x1 conv  ==  (X @ W_bf16) + bias, then SiLU.
# ----------------------------------------------------------------------------
def _matmul_bias_silu_kernel(x_ref, w_ref, b_ref, o_ref):
    x = x_ref[...].astype(jnp.bfloat16)
    acc = jnp.dot(x, w_ref[...], preferred_element_type=jnp.float32)
    y = acc + b_ref[...]
    o_ref[...] = (y * jax.nn.sigmoid(y)).astype(o_ref.dtype)


def matmul_bias_silu(x, w_bf16, bias2d, *, tm=256):
    """x: (M, K) f32, w_bf16: (K, Coutp) bf16 (BN scale folded, Coutp % 128 == 0),
    bias2d: (1, Coutp) f32. Returns (M, Coutp) f32."""
    M, K = x.shape
    K2, coutp = w_bf16.shape
    assert K == K2 and coutp % LANE == 0
    tm = min(tm, _round_up(M, 16))           # bf16-friendly sublane multiple
    Mp = _round_up(M, tm)
    if Mp != M:
        x = jnp.pad(x, ((0, Mp - M), (0, 0)))
    grid = (Mp // tm,)

    need = 2 * (tm * K * 4 + tm * coutp * 4) + K * coutp * 2 + coutp * 4
    out = pl.pallas_call(
        _matmul_bias_silu_kernel,
        out_shape=jax.ShapeDtypeStruct((Mp, coutp), jnp.float32),
        grid_spec=pltpu.PrefetchScalarGridSpec(
            num_scalar_prefetch=0,
            grid=grid,
            in_specs=[
                pl.BlockSpec((tm, K), lambda i: (i, 0)),
                pl.BlockSpec((K, coutp), lambda i: (0, 0)),
                pl.BlockSpec((1, coutp), lambda i: (0, 0)),
            ],
            out_specs=pl.BlockSpec((tm, coutp), lambda i: (i, 0)),
        ),
        compiler_params=pltpu.CompilerParams(
            dimension_semantics=("parallel",),
            vmem_limit_bytes=_vmem_limit(need)),
        cost_estimate=pl.CostEstimate(
            flops=2 * Mp * K * coutp,
            transcendentals=Mp * coutp,
            bytes_accessed=Mp * K * 4 + K * coutp * 2 + Mp * coutp * 4),
    )(x, w_bf16, bias2d)
    if Mp != M:
        out = out[:M]
    return out


def conv1x1_bn_silu(x_nhwc, p, cout):
    n, h, w_, cin = x_nhwc.shape
    out = matmul_bias_silu(x_nhwc.reshape(n * h * w_, cin), p["w"], p["b"])
    return out[:, :cout].reshape(n, h, w_, cout)


# ----------------------------------------------------------------------------
# Kernel 2: fused 3x3 conv (stride 1, pad 1) + bias + SiLU.
# The padded NHWC image of one batch element sits in VMEM; the 9 (dy, dx) taps
# are sliced in-kernel and accumulated in f32 -> no HBM im2col tensor.
# ----------------------------------------------------------------------------
def _conv3x3_bias_silu_kernel(x_ref, w_ref, b_ref, o_ref, *, th, W, cin):
    # x_ref: (1, H+2, W+2, cin) f32   w_ref: (3, 3, cin, coutp) bf16
    # b_ref: (1, coutp) f32           o_ref: (1, th, W, coutp) f32
    coutp = o_ref.shape[-1]
    h0 = pl.program_id(1) * th
    acc = jnp.zeros((th * W, coutp), jnp.float32)
    for dy in range(3):
        for dx in range(3):
            patch = x_ref[0, pl.ds(h0 + dy, th), pl.ds(dx, W), :]   # (th, W, cin)
            patch = patch.reshape(th * W, cin).astype(jnp.bfloat16)
            acc = acc + jnp.dot(patch, w_ref[dy, dx],
                                preferred_element_type=jnp.float32)
    y = acc + b_ref[...]
    o_ref[...] = (y * jax.nn.sigmoid(y)).astype(o_ref.dtype).reshape(1, th, W, coutp)


def _choose_th(h, w, coutp, budget=4 << 20):
    best = 1
    for th in range(1, h + 1):
        if h % th == 0 and th * w * coutp * 4 <= budget:
            best = th
    return best


def conv3x3_bn_silu(x_nhwc, p, cout):
    n, h, w_, cin = x_nhwc.shape
    coutp = p["w"].shape[-1]
    xp = jnp.pad(x_nhwc, ((0, 0), (1, 1), (1, 1), (0, 0)))           # spatial pad 1
    hp, wp = h + 2, w_ + 2
    th = _choose_th(h, w_, coutp)
    grid = (n, h // th)

    kernel = functools.partial(_conv3x3_bias_silu_kernel, th=th, W=w_, cin=cin)
    need = (2 * hp * wp * cin * 4 + 9 * cin * coutp * 2
            + 3 * th * w_ * coutp * 4 + coutp * 4)
    out = pl.pallas_call(
        kernel,
        out_shape=jax.ShapeDtypeStruct((n, h, w_, coutp), jnp.float32),
        grid_spec=pltpu.PrefetchScalarGridSpec(
            num_scalar_prefetch=0,
            grid=grid,
            in_specs=[
                pl.BlockSpec((1, hp, wp, cin), lambda b, t: (b, 0, 0, 0)),
                pl.BlockSpec((3, 3, cin, coutp), lambda b, t: (0, 0, 0, 0)),
                pl.BlockSpec((1, coutp), lambda b, t: (0, 0)),
            ],
            out_specs=pl.BlockSpec((1, th, w_, coutp), lambda b, t: (b, t, 0, 0)),
        ),
        compiler_params=pltpu.CompilerParams(
            dimension_semantics=("parallel", "parallel"),
            vmem_limit_bytes=_vmem_limit(need)),
        cost_estimate=pl.CostEstimate(
            flops=2 * n * h * w_ * 9 * cin * coutp,
            transcendentals=n * h * w_ * coutp,
            bytes_accessed=(n * hp * wp * cin * 4 + 9 * cin * coutp * 2
                            + n * h * w_ * coutp * 4)),
    )(xp, p["w"], p["b"])
    return out[..., :cout]


# ----------------------------------------------------------------------------
# Parameters. Raw (PyTorch-like) params are used by the reference; the kernel
# params are derived once: BN scale folded into weights, bf16 cast, Cout padded
# to a multiple of 128 (lane-dense output stores).
# ----------------------------------------------------------------------------
def init_c2f_params(key, c1, c2, n=1, e=0.5):
    c = int(c2 * e)
    keys = jax.random.split(key, 2 + 2 * n)

    def conv_bn(k, cin, cout, ksize):
        kw, kg, kb = jax.random.split(k, 3)
        fan_in = cin * ksize * ksize
        w = jax.random.normal(kw, (cout, cin, ksize, ksize), jnp.float32) / jnp.sqrt(fan_in)
        gamma = 1.0 + 0.1 * jax.random.normal(kg, (cout,), jnp.float32)
        beta = 0.1 * jax.random.normal(kb, (cout,), jnp.float32)
        return {"w": w, "gamma": gamma, "beta": beta}

    raw = {
        "cv1": conv_bn(keys[0], c1, 2 * c, 1),
        "cv2": conv_bn(keys[1], (2 + n) * c, c2, 1),
        "m": [{"cv1": conv_bn(keys[2 + 2 * i], c, c, 3),
               "cv2": conv_bn(keys[3 + 2 * i], c, c, 3)} for i in range(n)],
    }
    return raw


def _prep_conv(raw):
    # eval-mode BN (running_mean=0, running_var=1): scale = gamma / sqrt(1+eps)
    scale = raw["gamma"] / jnp.sqrt(1.0 + _BN_EPS)
    w = raw["w"] * scale[:, None, None, None]        # fold scale into weights
    b = raw["beta"]
    cout, cin, kh, kw = w.shape
    coutp = _round_up(cout, LANE)
    if kh == 1:
        wmat = w.reshape(cout, cin).T                              # (cin, cout)
        wmat = jnp.pad(wmat, ((0, 0), (0, coutp - cout)))
    else:
        wmat = jnp.transpose(w, (2, 3, 1, 0))                      # (3,3,cin,cout)
        wmat = jnp.pad(wmat, ((0, 0), (0, 0), (0, 0), (0, coutp - cout)))
    bias = jnp.pad(b, (0, coutp - cout)).reshape(1, coutp).astype(jnp.float32)
    return {"w": wmat.astype(jnp.bfloat16), "b": bias}


def prepare_kernel_params(raw):
    return {
        "cv1": _prep_conv(raw["cv1"]),
        "cv2": _prep_conv(raw["cv2"]),
        "m": [{"cv1": _prep_conv(bp["cv1"]), "cv2": _prep_conv(bp["cv2"])}
              for bp in raw["m"]],
    }


# ----------------------------------------------------------------------------
# C2f forward (NCHW in / NCHW out). Architecture config (c, c2, shortcut) is
# static (baked via functools.partial), so channel splits are static slices.
# ----------------------------------------------------------------------------
def c2f_forward(x_nchw, kp, *, c, c2, shortcut=False):
    x = jnp.transpose(x_nchw, (0, 2, 3, 1))                 # NCHW -> NHWC
    y = conv1x1_bn_silu(x, kp["cv1"], 2 * c)
    ys = [y[..., :c], y[..., c:2 * c]]
    cur = ys[-1]
    for bp in kp["m"]:
        t = conv3x3_bn_silu(cur, bp["cv1"], c)
        t = conv3x3_bn_silu(t, bp["cv2"], c)
        cur = cur + t if shortcut else t                    # Bottleneck add
        ys.append(cur)
    # TODO(synk): fuse this concat + cv2 into one kernel (per-segment K matmuls).
    out = conv1x1_bn_silu(jnp.concatenate(ys, axis=-1), kp["cv2"], c2)
    return jnp.transpose(out, (0, 3, 1, 2))                 # NHWC -> NCHW


# ----------------------------------------------------------------------------
# Pure-JAX f32 reference (lax conv) for correctness checking.
# ----------------------------------------------------------------------------
def _ref_conv_bn_silu(x_nhwc, raw):
    scale = raw["gamma"] / jnp.sqrt(1.0 + _BN_EPS)
    w = jnp.transpose(raw["w"], (2, 3, 1, 0))               # OIHW -> HWIO
    y = jax.lax.conv_general_dilated(
        x_nhwc, w, window_strides=(1, 1), padding="SAME",
        dimension_numbers=("NHWC", "HWIO", "NHWC"))
    y = y * scale + raw["beta"]
    return y * jax.nn.sigmoid(y)


def _ref_c2f(x_nchw, raw, *, c, shortcut=False):
    x = jnp.transpose(x_nchw, (0, 2, 3, 1))
    y = _ref_conv_bn_silu(x, raw["cv1"])
    ys = [y[..., :c], y[..., c:]]
    cur = ys[-1]
    for bp in raw["m"]:
        t = _ref_conv_bn_silu(cur, bp["cv1"])
        t = _ref_conv_bn_silu(t, bp["cv2"])
        cur = cur + t if shortcut else t
        ys.append(cur)
    out = _ref_conv_bn_silu(jnp.concatenate(ys, axis=-1), raw["cv2"])
    return jnp.transpose(out, (0, 3, 1, 2))


if __name__ == "__main__":
    # C2f(c1=8, c2=8, n=1, shortcut=False): hidden width c = 4
    c1, c2, n = 8, 8, 1
    shortcut = False
    c = int(c2 * 0.5)

    key = jax.random.PRNGKey(0)
    kx, kparam = jax.random.split(key)
    x = jax.random.normal(kx, (2, c1, 16, 16), jnp.float32)   # NCHW like PyTorch

    raw = init_c2f_params(kparam, c1, c2, n=n)
    kp = prepare_kernel_params(raw)

    fwd = jax.jit(functools.partial(c2f_forward, c=c, c2=c2, shortcut=shortcut))
    out = jax.block_until_ready(fwd(x, kp))

    ref = _ref_c2f(x, raw, c=c, shortcut=shortcut)
    assert out.shape == (2, c2, 16, 16), out.shape
    max_err = float(jnp.max(jnp.abs(out - ref)))
    # bf16 MXU operands vs f32 reference -> loosened tolerance
    assert jnp.allclose(out, ref, atol=4e-2, rtol=4e-2), f"mismatch, max|diff|={max_err}"
    print("KERNEL_OK")
</pallas_src>

<mosaic_0001>
module attributes {stable_mosaic.version = 11 : i64} {
  func.func @_matmul_bias_silu_kernel(%arg0: i32, %arg1: memref<256x8xf32, #tpu.memory_space<vmem>>, %arg2: memref<8x128xbf16, #tpu.memory_space<vmem>>, %arg3: memref<1x128xf32, #tpu.memory_space<vmem>>, %arg4: memref<256x128xf32, #tpu.memory_space<vmem>>) attributes {dimension_semantics = [#tpu.dimension_semantics<parallel>], iteration_bounds = array<i64: 2>, scalar_prefetch = 0 : i64, scratch_operands = 0 : i64, tpu.core_type = #tpu.core_type<tc>, window_params = [{transform_indices = @transform_0, window_bounds = array<i64: 256, 8>}, {pipeline_mode = #tpu.pipeline_mode<synchronous>, transform_indices = @transform_1, window_bounds = array<i64: 8, 128>}, {pipeline_mode = #tpu.pipeline_mode<synchronous>, transform_indices = @transform_2, window_bounds = array<i64: 1, 128>}, {transform_indices = @transform_3, window_bounds = array<i64: 256, 128>}]} {
    %c0 = arith.constant 0 : index
    %c0_0 = arith.constant 0 : index
    %0 = vector.load %arg1[%c0, %c0_0] : memref<256x8xf32, #tpu.memory_space<vmem>>, vector<256x8xf32>
    %1 = arith.truncf %0 : vector<256x8xf32> to vector<256x8xbf16>
    %c0_1 = arith.constant 0 : index
    %c0_2 = arith.constant 0 : index
    %2 = vector.load %arg2[%c0_1, %c0_2] : memref<8x128xbf16, #tpu.memory_space<vmem>>, vector<8x128xbf16>
    %cst = arith.constant dense<0.000000e+00> : vector<256x128xf32>
    %3 = tpu.matmul %1, %2, %cst {dimension_numbers = #tpu.dot_dimension_numbers<[1], [0], [0], [1], [0, 0, 1, 1], [], []>} : vector<256x8xbf16>, vector<8x128xbf16>, vector<256x128xf32> -> vector<256x128xf32>
    %c0_3 = arith.constant 0 : index
    %c0_4 = arith.constant 0 : index
    %4 = vector.load %arg3[%c0_3, %c0_4] : memref<1x128xf32, #tpu.memory_space<vmem>>, vector<1x128xf32>
    %5 = vector.broadcast %4 : vector<1x128xf32> to vector<256x128xf32>
    %6 = arith.addf %3, %5 : vector<256x128xf32>
    %7 = arith.negf %6 : vector<256x128xf32>
    %8 = math.exp %7 : vector<256x128xf32>
    %cst_5 = arith.constant 1.000000e+00 : f32
    %9 = vector.broadcast %cst_5 : f32 to vector<256x128xf32>
    %10 = arith.addf %9, %8 : vector<256x128xf32>
    %11 = arith.divf %9, %10 : vector<256x128xf32>
    %12 = arith.mulf %6, %11 : vector<256x128xf32>
    %c0_6 = arith.constant 0 : index
    %c0_7 = arith.constant 0 : index
    %13 = vector.load %arg4[%c0_6, %c0_7] : memref<256x128xf32, #tpu.memory_space<vmem>>, vector<256x128xf32>
    tpu.vector_store %arg4[%c0_6, %c0_7], %12 {strides = array<i32>} : memref<256x128xf32, #tpu.memory_space<vmem>>, vector<256x128xf32>,
    return
  }
  func.func @transform_0(%arg0: i32) -> (i32, i32) {
    %c0_i32 = arith.constant 0 : i32
    %c0_i32_0 = arith.constant 0 : i32
    return %arg0, %c0_i32 : i32, i32
  }
  func.func @transform_1(%arg0: i32) -> (i32, i32) {
    %c0_i32 = arith.constant 0 : i32
    %c0_i32_0 = arith.constant 0 : i32
    %c0_i32_1 = arith.constant 0 : i32
    return %c0_i32, %c0_i32_0 : i32, i32
  }
  func.func @transform_2(%arg0: i32) -> (i32, i32) {
    %c0_i32 = arith.constant 0 : i32
    %c0_i32_0 = arith.constant 0 : i32
    %c0_i32_1 = arith.constant 0 : i32
    return %c0_i32, %c0_i32_0 : i32, i32
  }
  func.func @transform_3(%arg0: i32) -> (i32, i32) {
    %c0_i32 = arith.constant 0 : i32
    %c0_i32_0 = arith.constant 0 : i32
    return %arg0, %c0_i32 : i32, i32
  }
}

module attributes {stable_mosaic.version = 11 : i64} {
  func.func @_conv3x3_bias_silu_kernel(%arg0: i32, %arg1: i32, %arg2: memref<1x18x18x4xf32, #tpu.memory_space<vmem>>, %arg3: memref<3x3x4x128xbf16, #tpu.memory_space<vmem>>, %arg4: memref<1x128xf32, #tpu.memory_space<vmem>>, %arg5: memref<1x16x16x128xf32, #tpu.memory_space<vmem>>) attributes {dimension_semantics = [#tpu.dimension_semantics<parallel>, #tpu.dimension_semantics<parallel>], iteration_bounds = array<i64: 2, 1>, scalar_prefetch = 0 : i64, scratch_operands = 0 : i64, tpu.core_type = #tpu.core_type<tc>, window_params = [{transform_indices = @transform_0, window_bounds = array<i64: 1, 18, 18, 4>}, {pipeline_mode = #tpu.pipeline_mode<synchronous>, transform_indices = @transform_1, window_bounds = array<i64: 3, 3, 4, 128>}, {pipeline_mode = #tpu.pipeline_mode<synchronous>, transform_indices = @transform_2, window_bounds = array<i64: 1, 128>}, {transform_indices = @transform_3, window_bounds = array<i64: 1, 16, 16, 128>}]} {
    %c16_i32 = arith.constant 16 : i32
    %0 = arith.muli %arg1, %c16_i32 : i32
    %cst = arith.constant 0.000000e+00 : f32
    %1 = vector.broadcast %cst : f32 to vector<256x128xf32>
    %c0_i32 = arith.constant 0 : i32
    %2 = arith.addi %0, %c0_i32 : i32
    %c0 = arith.constant 0 : index
    %3 = arith.index_cast %2 : i32 to index
    %c0_0 = arith.constant 0 : index
    %c0_1 = arith.constant 0 : index
    %4 = vector.load %arg2[%c0, %3, %c0_0, %c0_1] : memref<1x18x18x4xf32, #tpu.memory_space<vmem>>, vector<1x16x16x4xf32>
    %5 = vector.shape_cast %4 : vector<1x16x16x4xf32> to vector<16x16x4xf32>
    %6 = vector.shape_cast %5 : vector<16x16x4xf32> to vector<256x4xf32>
    %7 = arith.truncf %6 : vector<256x4xf32> to vector<256x4xbf16>
    %c0_2 = arith.constant 0 : index
    %c0_3 = arith.constant 0 : index
    %c0_4 = arith.constant 0 : index
    %c0_5 = arith.constant 0 : index
    %8 = vector.load %arg3[%c0_2, %c0_3, %c0_4, %c0_5] : memref<3x3x4x128xbf16, #tpu.memory_space<vmem>>, vector<1x1x4x128xbf16>
    %9 = vector.shape_cast %8 : vector<1x1x4x128xbf16> to vector<4x128xbf16>
    %cst_6 = arith.constant dense<0.000000e+00> : vector<256x128xf32>
    %10 = tpu.matmul %7, %9, %cst_6 {dimension_numbers = #tpu.dot_dimension_numbers<[1], [0], [0], [1], [0, 0, 1, 1], [], []>} : vector<256x4xbf16>, vector<4x128xbf16>, vector<256x128xf32> -> vector<256x128xf32>
    %11 = arith.addf %1, %10 : vector<256x128xf32>
    %c0_i32_7 = arith.constant 0 : i32
    %12 = arith.addi %0, %c0_i32_7 : i32
    %c0_8 = arith.constant 0 : index
    %13 = arith.index_cast %12 : i32 to index
    %c1 = arith.constant 1 : index
    %c0_9 = arith.constant 0 : index
    %14 = vector.load %arg2[%c0_8, %13, %c1, %c0_9] : memref<1x18x18x4xf32, #tpu.memory_space<vmem>>, vector<1x16x16x4xf32>
    %15 = vector.shape_cast %14 : vector<1x16x16x4xf32> to vector<16x16x4xf32>
    %16 = vector.shape_cast %15 : vector<16x16x4xf32> to vector<256x4xf32>
    %17 = arith.truncf %16 : vector<256x4xf32> to vector<256x4xbf16>
    %c0_10 = arith.constant 0 : index
    %c1_11 = arith.constant 1 : index
    %c0_12 = arith.constant 0 : index
    %c0_13 = arith.constant 0 : index
    %18 = vector.load %arg3[%c0_10, %c1_11, %c0_12, %c0_13] : memref<3x3x4x128xbf16, #tpu.memory_space<vmem>>, vector<1x1x4x128xbf16>
    %19 = vector.shape_cast %18 : vector<1x1x4x128xbf16> to vector<4x128xbf16>
    %cst_14 = arith.constant dense<0.000000e+00> : vector<256x128xf32>
    %20 = tpu.matmul %17, %19, %cst_14 {dimension_numbers = #tpu.dot_dimension_numbers<[1], [0], [0], [1], [0, 0, 1, 1], [], []>} : vector<256x4xbf16>, vector<4x128xbf16>, vector<256x128xf32> -> vector<256x128xf32>
    %21 = arith.addf %11, %20 : vector<256x128xf32>
    %c0_i32_15 = arith.constant 0 : i32
    %22 = arith.addi %0, %c0_i32_15 : i32
    %c0_16 = arith.constant 0 : index
    %23 = arith.index_cast %22 : i32 to index
    %c2 = arith.constant 2 : index
    %c0_17 = arith.constant 0 : index
    %24 = vector.load %arg2[%c0_16, %23, %c2, %c0_17] : memref<1x18x18x4xf32, #tpu.memory_space<vmem>>, vector<1x16x16x4xf32>
    %25 = vector.shape_cast %24 : vector<1x16x16x4xf32> to vector<16x16x4xf32>
    %26 = vector.shape_cast %25 : vector<16x16x4xf32> to vector<256x4xf32>
    %27 = arith.truncf %26 : vector<256x4xf32> to vector<256x4xbf16>
    %c0_18 = arith.constant 0 : index
    %c2_19 = arith.constant 2 : index
    %c0_20 = arith.constant 0 : index
    %c0_21 = arith.constant 0 : index
    %28 = vector.load %arg3[%c0_18, %c2_19, %c0_20, %c0_21] : memref<3x3x4x128xbf16, #tpu.memory_space<vmem>>, vector<1x1x4x128xbf16>
    %29 = vector.shape_cast %28 : vector<1x1x4x128xbf16> to vector<4x128xbf16>
    %cst_22 = arith.constant dense<0.000000e+00> : vector<256x128xf32>
    %30 = tpu.matmul %27, %29, %cst_22 {dimension_numbers = #tpu.dot_dimension_numbers<[1], [0], [0], [1], [0, 0, 1, 1], [], []>} : vector<256x4xbf16>, vector<4x128xbf16>, vector<256x128xf32> -> vector<256x128xf32>
    %31 = arith.addf %21, %30 : vector<256x128xf32>
    %c1_i32 = arith.constant 1 : i32
    %32 = arith.addi %0, %c1_i32 : i32
    %c0_23 = arith.constant 0 : index
    %33 = arith.index_cast %32 : i32 to index
    %c0_24 = arith.constant 0 : index
    %c0_25 = arith.constant 0 : index
    %34 = vector.load %arg2[%c0_23, %33, %c0_24, %c0_25] : memref<1x18x18x4xf32, #tpu.memory_space<vmem>>, vector<1x16x16x4xf32>
    %35 = vector.shape_cast %34 : vector<1x16x16x4xf32> to vector<16x16x4xf32>
    %36 = vector.shape_cast %35 : vector<16x16x4xf32> to vector<256x4xf32>
    %37 = arith.truncf %36 : vector<256x4xf32> to vector<256x4xbf16>
    %c1_26 = arith.constant 1 : index
    %c0_27 = arith.constant 0 : index
    %c0_28 = arith.constant 0 : index
    %c0_29 = arith.constant 0 : index
    %38 = vector.load %arg3[%c1_26, %c0_27, %c0_28, %c0_29] : memref<3x3x4x128xbf16, #tpu.memory_space<vmem>>, vector<1x1x4x128xbf16>
    %39 = vector.shape_cast %38 : vector<1x1x4x128xbf16> to vector<4x128xbf16>
    %cst_30 = arith.constant dense<0.000000e+00> : vector<256x128xf32>
    %40 = tpu.matmul %37, %39, %cst_30 {dimension_numbers = #tpu.dot_dimension_numbers<[1], [0], [0], [1], [0, 0, 1, 1], [], []>} : vector<256x4xbf16>, vector<4x128xbf16>, vector<256x128xf32> -> vector<256x128xf32>
    %41 = arith.addf %31, %40 : vector<256x128xf32>
    %c1_i32_31 = arith.constant 1 : i32
    %42 = arith.addi %0, %c1_i32_31 : i32
    %c0_32 = arith.constant 0 : index
    %43 = arith.index_cast %42 : i32 to index
    %c1_33 = arith.constant 1 : index
    %c0_34 = arith.constant 0 : index
    %44 = vector.load %arg2[%c0_32, %43, %c1_33, %c0_34] : memref<1x18x18x4xf32, #tpu.memory_space<vmem>>, vector<1x16x16x4xf32>
    %45 = vector.shape_cast %44 : vector<1x16x16x4xf32> to vector<16x16x4xf32>
    %46 = vector.shape_cast %45 : vector<16x16x4xf32> to vector<256x4xf32>
    %47 = arith.truncf %46 : vector<256x4xf32> to vector<256x4xbf16>
    %c1_35 = arith.constant 1 : index
    %c1_36 = arith.constant 1 : index
    %c0_37 = arith.constant 0 : index
    %c0_38 = arith.constant 0 : index
    %48 = vector.load %arg3[%c1_35, %c1_36, %c0_37, %c0_38] : memref<3x3x4x128xbf16, #tpu.memory_space<vmem>>, vector<1x1x4x128xbf16>
    %49 = vector.shape_cast %48 : vector<1x1x4x128xbf16> to vector<4x128xbf16>
    %cst_39 = arith.constant dense<0.000000e+00> : vector<256x128xf32>
    %50 = tpu.matmul %47, %49, %cst_39 {dimension_numbers = #tpu.dot_dimension_numbers<[1], [0], [0], [1], [0, 0, 1, 1], [], []>} : vector<256x4xbf16>, vector<4x128xbf16>, vector<256x128xf32> -> vector<256x128xf32>
    %51 = arith.addf %41, %50 : vector<256x128xf32>
    %c1_i32_40 = arith.constant 1 : i32
    %52 = arith.addi %0, %c1_i32_40 : i32
    %c0_41 = arith.constant 0 : index
    %53 = arith.index_cast %52 : i32 to index
    %c2_42 = arith.constant 2 : index
    %c0_43 = arith.constant 0 : index
    %54 = vector.load %arg2[%c0_41, %53, %c2_42, %c0_43] : memref<1x18x18x4xf32, #tpu.memory_space<vmem>>, vector<1x16x16x4xf32>
    %55 = vector.shape_cast %54 : vector<1x16x16x4xf32> to vector<16x16x4xf32>
    %56 = vector.shape_cast %55 : vector<16x16x4xf32> to vector<256x4xf32>
    %57 = arith.truncf %56 : vector<256x4xf32> to vector<256x4xbf16>
    %c1_44 = arith.constant 1 : index
    %c2_45 = arith.constant 2 : index
    %c0_46 = arith.constant 0 : index
    %c0_47 = arith.constant 0 : index
    %58 = vector.load %arg3[%c1_44, %c2_45, %c0_46, %c0_47] : memref<3x3x4x128xbf16, #tpu.memory_space<vmem>>, vector<1x1x4x128xbf16>
    %59 = vector.shape_cast %58 : vector<1x1x4x128xbf16> to vector<4x128xbf16>
    %cst_48 = arith.constant dense<0.000000e+00> : vector<256x128xf32>
    %60 = tpu.matmul %57, %59, %cst_48 {dimension_numbers = #tpu.dot_dimension_numbers<[1], [0], [0], [1], [0, 0, 1, 1], [], []>} : vector<256x4xbf16>, vector<4x128xbf16>, vector<256x128xf32> -> vector<256x128xf32>
    %61 = arith.addf %51, %60 : vector<256x128xf32>
    %c2_i32 = arith.constant 2 : i32
    %62 = arith.addi %0, %c2_i32 : i32
    %c0_49 = arith.constant 0 : index
    %63 = arith.index_cast %62 : i32 to index
    %c0_50 = arith.constant 0 : index
    %c0_51 = arith.constant 0 : index
    %64 = vector.load %arg2[%c0_49, %63, %c0_50, %c0_51] : memref<1x18x18x4xf32, #tpu.memory_space<vmem>>, vector<1x16x16x4xf32>
    %65 = vector.shape_cast %64 : vector<1x16x16x4xf32> to vector<16x16x4xf32>
    %66 = vector.shape_cast %65 : vector<16x16x4xf32> to vector<256x4xf32>
    %67 = arith.truncf %66 : vector<256x4xf32> to vector<256x4xbf16>
    %c2_52 = arith.constant 2 : index
    %c0_53 = arith.constant 0 : index
    %c0_54 = arith.constant 0 : index
    %c0_55 = arith.constant 0 : index
    %68 = vector.load %arg3[%c2_52, %c0_53, %c0_54, %c0_55] : memref<3x3x4x128xbf16, #tpu.memory_space<vmem>>, vector<1x1x4x128xbf16>
    %69 = vector.shape_cast %68 : vector<1x1x4x128xbf16> to vector<4x128xbf16>
    %cst_56 = arith.constant dense<0.000000e+00> : vector<256x128xf32>
    %70 = tpu.matmul %67, %69, %cst_56 {dimension_numbers = #tpu.dot_dimension_numbers<[1], [0], [0], [1], [0, 0, 1, 1], [], []>} : vector<256x4xbf16>, vector<4x128xbf16>, vector<256x128xf32> -> vector<256x128xf32>
    %71 = arith.addf %61, %70 : vector<256x128xf32>
    %c2_i32_57 = arith.constant 2 : i32
    %72 = arith.addi %0, %c2_i32_57 : i32
    %c0_58 = arith.constant 0 : index
    %73 = arith.index_cast %72 : i32 to index
    %c1_59 = arith.constant 1 : index
    %c0_60 = arith.constant 0 : index
    %74 = vector.load %arg2[%c0_58, %73, %c1_59, %c0_60] : memref<1x18x18x4xf32, #tpu.memory_space<vmem>>, vector<1x16x16x4xf32>
    %75 = vector.shape_cast %74 : vector<1x16x16x4xf32> to vector<16x16x4xf32>
    %76 = vector.shape_cast %75 : vector<16x16x4xf32> to vector<256x4xf32>
    %77 = arith.truncf %76 : vector<256x4xf32> to vector<256x4xbf16>
    %c2_61 = arith.constant 2 : index
    %c1_62 = arith.constant 1 : index
    %c0_63 = arith.constant 0 : index
    %c0_64 = arith.constant 0 : index
    %78 = vector.load %arg3[%c2_61, %c1_62, %c0_63, %c0_64] : memref<3x3x4x128xbf16, #tpu.memory_space<vmem>>, vector<1x1x4x128xbf16>
    %79 = vector.shape_cast %78 : vector<1x1x4x128xbf16> to vector<4x128xbf16>
    %cst_65 = arith.constant dense<0.000000e+00> : vector<256x128xf32>
    %80 = tpu.matmul %77, %79, %cst_65 {dimension_numbers = #tpu.dot_dimension_numbers<[1], [0], [0], [1], [0, 0, 1, 1], [], []>} : vector<256x4xbf16>, vector<4x128xbf16>, vector<256x128xf32> -> vector<256x128xf32>
    %81 = arith.addf %71, %80 : vector<256x128xf32>
    %c2_i32_66 = arith.constant 2 : i32
    %82 = arith.addi %0, %c2_i32_66 : i32
    %c0_67 = arith.constant 0 : index
    %83 = arith.index_cast %82 : i32 to index
    %c2_68 = arith.constant 2 : index
    %c0_69 = arith.constant 0 : index
    %84 = vector.load %arg2[%c0_67, %83, %c2_68, %c0_69] : memref<1x18x18x4xf32, #tpu.memory_space<vmem>>, vector<1x16x16x4xf32>
    %85 = vector.shape_cast %84 : vector<1x16x16x4xf32> to vector<16x16x4xf32>
    %86 = vector.shape_cast %85 : vector<16x16x4xf32> to vector<256x4xf32>
    %87 = arith.truncf %86 : vector<256x4xf32> to vector<256x4xbf16>
    %c2_70 = arith.constant 2 : index
    %c2_71 = arith.constant 2 : index
    %c0_72 = arith.constant 0 : index
    %c0_73 = arith.constant 0 : index
    %88 = vector.load %arg3[%c2_70, %c2_71, %c0_72, %c0_73] : memref<3x3x4x128xbf16, #tpu.memory_space<vmem>>, vector<1x1x4x128xbf16>
    %89 = vector.shape_cast %88 : vector<1x1x4x128xbf16> to vector<4x128xbf16>
    %cst_74 = arith.constant dense<0.000000e+00> : vector<256x128xf32>
    %90 = tpu.matmul %87, %89, %cst_74 {dimension_numbers = #tpu.dot_dimension_numbers<[1], [0], [0], [1], [0, 0, 1, 1], [], []>} : vector<256x4xbf16>, vector<4x128xbf16>, vector<256x128xf32> -> vector<256x128xf32>
    %91 = arith.addf %81, %90 : vector<256x128xf32>
    %c0_75 = arith.constant 0 : index
    %c0_76 = arith.constant 0 : index
    %92 = vector.load %arg4[%c0_75, %c0_76] : memref<1x128xf32, #tpu.memory_space<vmem>>, vector<1x128xf32>
    %93 = vector.broadcast %92 : vector<1x128xf32> to vector<256x128xf32>
    %94 = arith.addf %91, %93 : vector<256x128xf32>
    %95 = arith.negf %94 : vector<256x128xf32>
    %96 = math.exp %95 : vector<256x128xf32>
    %cst_77 = arith.constant 1.000000e+00 : f32
    %97 = vector.broadcast %cst_77 : f32 to vector<256x128xf32>
    %98 = arith.addf %97, %96 : vector<256x128xf32>
    %99 = arith.divf %97, %98 : vector<256x128xf32>
    %100 = arith.mulf %94, %99 : vector<256x128xf32>
    %101 = vector.shape_cast %100 : vector<256x128xf32> to vector<1x16x16x128xf32>
    %c0_78 = arith.constant 0 : index
    %c0_79 = arith.constant 0 : index
    %c0_80 = arith.constant 0 : index
    %c0_81 = arith.constant 0 : index
    %102 = vector.load %arg5[%c0_78, %c0_79, %c0_80, %c0_81] : memref<1x16x16x128xf32, #tpu.memory_space<vmem>>, vector<1x16x16x128xf32>
    tpu.vector_store %arg5[%c0_78, %c0_79, %c0_80, %c0_81], %101 {strides = array<i32>} : memref<1x16x16x128xf32, #tpu.memory_space<vmem>>, vector<1x16x16x128xf32>,
    return
  }
  func.func @transform_0(%arg0: i32, %arg1: i32) -> (i32, i32, i32, i32) {
    %c0_i32 = arith.constant 0 : i32
    %c0_i32_0 = arith.constant 0 : i32
    %c0_i32_1 = arith.constant 0 : i32
    %c0_i32_2 = arith.constant 0 : i32
    return %arg0, %c0_i32, %c0_i32_0, %c0_i32_1 : i32, i32, i32, i32
  }
  func.func @transform_1(%arg0: i32, %arg1: i32) -> (i32, i32, i32, i32) {
    %c0_i32 = arith.constant 0 : i32
    %c0_i32_0 = arith.constant 0 : i32
    %c0_i32_1 = arith.constant 0 : i32
    %c0_i32_2 = arith.constant 0 : i32
    %c0_i32_3 = arith.constant 0 : i32
    return %c0_i32, %c0_i32_0, %c0_i32_1, %c0_i32_2 : i32, i32, i32, i32
  }
  func.func @transform_2(%arg0: i32, %arg1: i32) -> (i32, i32) {
    %c0_i32 = arith.constant 0 : i32
    %c0_i32_0 = arith.constant 0 : i32
    %c0_i32_1 = arith.constant 0 : i32
    return %c0_i32, %c0_i32_0 : i32, i32
  }
  func.func @transform_3(%arg0: i32, %arg1: i32) -> (i32, i32, i32, i32) {
    %c0_i32 = arith.constant 0 : i32
    %c0_i32_0 = arith.constant 0 : i32
    %c0_i32_1 = arith.constant 0 : i32
    return %arg0, %arg1, %c0_i32, %c0_i32_0 : i32, i32, i32, i32
  }
}

module attributes {stable_mosaic.version = 11 : i64} {
  func.func @_matmul_bias_silu_kernel(%arg0: i32, %arg1: memref<256x12xf32, #tpu.memory_space<vmem>>, %arg2: memref<12x128xbf16, #tpu.memory_space<vmem>>, %arg3: memref<1x128xf32, #tpu.memory_space<vmem>>, %arg4: memref<256x128xf32, #tpu.memory_space<vmem>>) attributes {dimension_semantics = [#tpu.dimension_semantics<parallel>], iteration_bounds = array<i64: 2>, scalar_prefetch = 0 : i64, scratch_operands = 0 : i64, tpu.core_type = #tpu.core_type<tc>, window_params = [{transform_indices = @transform_0, window_bounds = array<i64: 256, 12>}, {pipeline_mode = #tpu.pipeline_mode<synchronous>, transform_indices = @transform_1, window_bounds = array<i64: 12, 128>}, {pipeline_mode = #tpu.pipeline_mode<synchronous>, transform_indices = @transform_2, window_bounds = array<i64: 1, 128>}, {transform_indices = @transform_3, window_bounds = array<i64: 256, 128>}]} {
    %c0 = arith.constant 0 : index
    %c0_0 = arith.constant 0 : index
    %0 = vector.load %arg1[%c0, %c0_0] : memref<256x12xf32, #tpu.memory_space<vmem>>, vector<256x12xf32>
    %1 = arith.truncf %0 : vector<256x12xf32> to vector<256x12xbf16>
    %c0_1 = arith.constant 0 : index
    %c0_2 = arith.constant 0 : index
    %2 = vector.load %arg2[%c0_1, %c0_2] : memref<12x128xbf16, #tpu.memory_space<vmem>>, vector<12x128xbf16>
    %cst = arith.constant dense<0.000000e+00> : vector<256x128xf32>
    %3 = tpu.matmul %1, %2, %cst {dimension_numbers = #tpu.dot_dimension_numbers<[1], [0], [0], [1], [0, 0, 1, 1], [], []>} : vector<256x12xbf16>, vector<12x128xbf16>, vector<256x128xf32> -> vector<256x128xf32>
    %c0_3 = arith.constant 0 : index
    %c0_4 = arith.constant 0 : index
    %4 = vector.load %arg3[%c0_3, %c0_4] : memref<1x128xf32, #tpu.memory_space<vmem>>, vector<1x128xf32>
    %5 = vector.broadcast %4 : vector<1x128xf32> to vector<256x128xf32>
    %6 = arith.addf %3, %5 : vector<256x128xf32>
    %7 = arith.negf %6 : vector<256x128xf32>
    %8 = math.exp %7 : vector<256x128xf32>
    %cst_5 = arith.constant 1.000000e+00 : f32
    %9 = vector.broadcast %cst_5 : f32 to vector<256x128xf32>
    %10 = arith.addf %9, %8 : vector<256x128xf32>
    %11 = arith.divf %9, %10 : vector<256x128xf32>
    %12 = arith.mulf %6, %11 : vector<256x128xf32>
    %c0_6 = arith.constant 0 : index
    %c0_7 = arith.constant 0 : index
    %13 = vector.load %arg4[%c0_6, %c0_7] : memref<256x128xf32, #tpu.memory_space<vmem>>, vector<256x128xf32>
    tpu.vector_store %arg4[%c0_6, %c0_7], %12 {strides = array<i32>} : memref<256x128xf32, #tpu.memory_space<vmem>>, vector<256x128xf32>,
    return
  }
  func.func @transform_0(%arg0: i32) -> (i32, i32) {
    %c0_i32 = arith.constant 0 : i32
    %c0_i32_0 = arith.constant 0 : i32
    return %arg0, %c0_i32 : i32, i32
  }
  func.func @transform_1(%arg0: i32) -> (i32, i32) {
    %c0_i32 = arith.constant 0 : i32
    %c0_i32_0 = arith.constant 0 : i32
    %c0_i32_1 = arith.constant 0 : i32
    return %c0_i32, %c0_i32_0 : i32, i32
  }
  func.func @transform_2(%arg0: i32) -> (i32, i32) {
    %c0_i32 = arith.constant 0 : i32
    %c0_i32_0 = arith.constant 0 : i32
    %c0_i32_1 = arith.constant 0 : i32
    return %c0_i32, %c0_i32_0 : i32, i32
  }
  func.func @transform_3(%arg0: i32) -> (i32, i32) {
    %c0_i32 = arith.constant 0 : i32
    %c0_i32_0 = arith.constant 0 : i32
    return %arg0, %c0_i32 : i32, i32
  }
}

</mosaic_0001>

<bundles_post_ra>
// kernel: c2f_forward.4
= control target key start
LH: loop header
LB: loop body
LE: loop exit
PB: predicated region body
PF: predicated region fallthrough
CT: control target
= control target key end

     0   :  { %s1036_s12 = smov 0   ;;  %s1336_s0 = inlined_call_operand.vmem [shape: f32[512,8], index: 0, kind: input, shape index: {}]   ;;  %s1337_s1 = inlined_call_operand.vmem [shape: bf16[8,128], index: 1, kind: input, shape index: {}]   ;;  %s1338_s2 = inlined_call_operand.vmem [shape: f32[1,128], index: 2, kind: input, shape index: {}]   ;;  %s1339_s3 = inlined_call_operand.vmem [shape: f32[512,128], index: 3, kind: output, shape index: {}]  }
   0x1 LB: > { %s757_s13 = sadd.s32 4294967295, %s1014_s12   ;;  %p761_p0 = scmp.ge.s32.totalorder %s1014_s12, 1  ;;  %s1014_s12 = sphi %s1036_s12, %s13_s12  }
   0x2   : > { %p138_p1 = scmp.lt.s32.totalorder %s1014_s12, 3 }
   0x4   : > { %p139_p2 = pnand %p761_p0, %p138_p1 }
   0x5   : > { %v223_v0 = vld [vmem:[%s1337_s1] sm:$0xf] (!%p139_p2)  ;;  %vm280_vm0 = vcmask (!%p139_p2), 1043456   ;;  %s762_s16 = sshll.u32 (!%p139_p2), %s757_s13, 5  ;;  %vm231_vm1 = vcmask (!%p139_p2), 64512  }
   0x6   : > { %142 = sbr.rel (%p139_p2) target bundleno = 322 (0x142), region = 32  ;;  %870 = vmatprep.subr.msk.bf16.mxu0 (!%p139_p2), %vm280_vm0, %v223_v0  ;;  %871 = vmatprep.subr.msk.bf16.mxu1 (!%p139_p2), %vm280_vm0, %v223_v0  ;;  %v282_v1 = vsel (!%p139_p2), %vm280_vm0, %v223_v0, 0  ;;  %p163_p3 = scmp.lt.s32.totalorder (!%p139_p2), %s762_s16, 63  ;;  %v1108_v50 = vld [vmem:[%s1338_s2] ss:$0 sm:$0xff] (!%p139_p2) }
   0x7   : > { %835 = vmatpush3.bf16.msra.mxu0 (!%p139_p2), %v282_v1  ;;  %869 = vmatpush3.bf16.msra.mxu1 (!%p139_p2), %v282_v1 }
   0xd   : > { %s1341_s16 = smov (!%p163_p3, %s762_s16), 63 }
   0xe   : > { %s763_s17 = sshll.u32 %s1341_s16, 3 }
   0xf   : > { %s1055_s20 = scalar_lea.vmem %s1336_s0, %s763_s17  ;;  %s1197_s25 = scalar_lea.vmem %s1339_s3, %s763_s17 }
  0x10   : > { %v175_v2 = vld [vmem:[%s1055_s20] sm:$0xff]  ;;  %v176_v3 = vld [vmem:[%s1055_s20 + $0x8] sm:$0xff]  ;;  %v177_v7 = vld [vmem:[%s1055_s20 + $0x10] sm:$0xff] }
  0x11   : > { %v191_v4 = vld [vmem:[%s1055_s20 + $0x80] sm:$0xff]  ;;  %v207_v5 = vpack.c.bf16 %v176_v3, %v175_v2  ;;  %v192_v6 = vld [vmem:[%s1055_s20 + $0x88] sm:$0xff]  ;;  %v178_v8 = vld [vmem:[%s1055_s20 + $0x18] sm:$0xff] }
  0x12   : > { %v215_v9 = vpack.c.bf16 %v192_v6, %v191_v4  ;;  %v208_v10 = vpack.c.bf16 %v178_v8, %v177_v7  ;;  %v193_v11 = vld [vmem:[%s1055_s20 + $0x90] sm:$0xff]  ;;  %v194_v12 = vld [vmem:[%s1055_s20 + $0x98] sm:$0xff]  ;;  %v179_v13 = vld [vmem:[%s1055_s20 + $0x20] sm:$0xff] }
  0x13   : > { %836 = vmatprep.mubr.msk.bf16.mxu0 %vm231_vm1, %v207_v5  ;;  %v216_v14 = vpack.c.bf16 %v194_v12, %v193_v11  ;;  %v180_v15 = vld [vmem:[%s1055_s20 + $0x28] sm:$0xff]  ;;  %v195_v16 = vld [vmem:[%s1055_s20 + $0xa0] sm:$0xff]  ;;  %v181_v20 = vld [vmem:[%s1055_s20 + $0x30] sm:$0xff] }
  0x14   : > { %v196_v17 = vld [vmem:[%s1055_s20 + $0xa8] sm:$0xff]  ;;  %852 = vmatprep.mubr.msk.bf16.mxu1 %vm231_vm1, %v215_v9  ;;  %837 = vmatmul.mubr.msk.bf16.vlgmr.msra.gmra.mrb[0].mxu0 %vm231_vm1, %v208_v10  ;;  %v209_v18 = vpack.c.bf16 %v180_v15, %v179_v13  ;;  %v182_v21 = vld [vmem:[%s1055_s20 + $0x38] sm:$0xff]  ;;  %v197_v22 = vld [vmem:[%s1055_s20 + $0xb0] sm:$0xff] }
  0x15   : > { %v217_v19 = vpack.c.bf16 %v196_v17, %v195_v16  ;;  %853 = vmatmul.mubr.msk.bf16.vlgmr.msra.gmra.mrb[0].mxu1 %vm231_vm1, %v216_v14  ;;  %v198_v23 = vld [vmem:[%s1055_s20 + $0xb8] sm:$0xff]  ;;  %v183_v24 = vld [vmem:[%s1055_s20 + $0x40] sm:$0xff]  ;;  %v184_v25 = vld [vmem:[%s1055_s20 + $0x48] sm:$0xff]  ;;  %v210_v28 = vpack.c.bf16 %v182_v21, %v181_v20 }
  0x16   : > { %840 = vmatprep.mubr.msk.bf16.mxu0 %vm231_vm1, %v209_v18  ;;  %v199_v26 = vld [vmem:[%s1055_s20 + $0xc0] sm:$0xff]  ;;  %v200_v27 = vld [vmem:[%s1055_s20 + $0xc8] sm:$0xff]  ;;  %v218_v29 = vpack.c.bf16 %v198_v23, %v197_v22  ;;  %v211_v30 = vpack.c.bf16 %v184_v25, %v183_v24  ;;  %v185_v32 = vld [vmem:[%s1055_s20 + $0x50] sm:$0xff] }
  0x17   : > { %856 = vmatprep.mubr.msk.bf16.mxu1 %vm231_vm1, %v217_v19  ;;  %v219_v31 = vpack.c.bf16 %v200_v27, %v199_v26  ;;  %v186_v33 = vld [vmem:[%s1055_s20 + $0x58] sm:$0xff]  ;;  %v201_v34 = vld [vmem:[%s1055_s20 + $0xd0] sm:$0xff]  ;;  %v187_v36 = vld [vmem:[%s1055_s20 + $0x60] sm:$0xff] }
  0x18   : > { %v202_v35 = vld [vmem:[%s1055_s20 + $0xd8] sm:$0xff]  ;;  %v188_v37 = vld [vmem:[%s1055_s20 + $0x68] sm:$0xff]  ;;  %v203_v38 = vld [vmem:[%s1055_s20 + $0xe0] sm:$0xff]  ;;  %v212_v40 = vpack.c.bf16 %v186_v33, %v185_v32 }
  0x19   : > { %v204_v39 = vld [vmem:[%s1055_s20 + $0xe8] sm:$0xff]  ;;  %v220_v41 = vpack.c.bf16 %v202_v35, %v201_v34  ;;  %v213_v42 = vpack.c.bf16 %v188_v37, %v187_v36  ;;  %v189_v44 = vld [vmem:[%s1055_s20 + $0x70] sm:$0xff]  ;;  %v190_v45 = vld [vmem:[%s1055_s20 + $0x78] sm:$0xff] }
  0x1a   : > { %v221_v43 = vpack.c.bf16 %v204_v39, %v203_v38  ;;  %v205_v46 = vld [vmem:[%s1055_s20 + $0xf0] sm:$0xff]  ;;  %v206_v47 = vld [vmem:[%s1055_s20 + $0xf8] sm:$0xff]  ;;  %v214_v48 = vpack.c.bf16 %v190_v45, %v189_v44 }
  0x1b   : > { %v222_v49 = vpack.c.bf16 %v206_v47, %v205_v46 }
  0x1c   : > { %841 = vmatmul.mubr.msk.bf16.gmra.mrb[4].mxu0 %vm231_vm1, %v210_v28 }
  0x1d   : > { %857 = vmatmul.mubr.msk.bf16.gmra.mrb[4].mxu1 %vm231_vm1, %v218_v29  ;;  %844 = vmatprep.mubr.msk.bf16.mxu0 %vm231_vm1, %v211_v30 }
  0x1e   : > { %860 = vmatprep.mubr.msk.bf16.mxu1 %vm231_vm1, %v219_v31 }
  0x24   : > { %845 = vmatmul.mubr.msk.bf16.gmra.mrb[8].mxu0 %vm231_vm1, %v212_v40 }
  0x25   : > { %861 = vmatmul.mubr.msk.bf16.gmra.mrb[8].mxu1 %vm231_vm1, %v220_v41  ;;  %848 = vmatprep.mubr.msk.bf16.mxu0 %vm231_vm1, %v213_v42 }
  0x26   : > { %864 = vmatprep.mubr.msk.bf16.mxu1 %vm231_vm1, %v221_v43 }
  0x2c   : > { %849 = vmatmul.mubr.msk.bf16.gmra.mrb[12].mxu0 %vm231_vm1, %v214_v48 }
  0x2d   : > { %865 = vmatmul.mubr.msk.bf16.gmra.mrb[12].mxu1 %vm231_vm1, %v222_v49 }
  0xe7   : > { %v838_v51 = vpop.f32.mrb[0].mxu0 }
  0xe8   : > { %v1111_v52 = vadd.f32 %v838_v51, %v1108_v50  ;;  %v854_v53 = vpop.f32.mrb[0].mxu1  ;;  %v318_v54 = vpop.f32.mrb[1].mxu0 }
  0xe9   : > { %v1114_v55 = vadd.f32 %v854_v53, %v1108_v50  ;;  %v1117_v56 = vadd.f32 %v1108_v50, %v318_v54  ;;  %v382_v57 = vpop.f32.mrb[1].mxu1  ;;  %v839_v58 = vpop.f32.mrb[2].mxu0 }
  0xea   : > { %v785_v59 = vmul.f32 -1.442695, %v1111_v52  ;;  %v1121_v60 = vadd.f32 %v1108_v50, %v382_v57  ;;  %v1124_v61 = vadd.f32 %v839_v58, %v1108_v50  ;;  %v855_v62 = vpop.f32.mrb[2].mxu1  ;;  %v321_v63 = vpop.f32.mrb[3].mxu0 }
  0xeb   : > { %v801_v0 = vmul.f32 -1.442695, %v1114_v55  ;;  %v783_v1 = vmul.f32 -1.442695, %v1117_v56  ;;  %v1129_v2 = vadd.f32 %v855_v62, %v1108_v50  ;;  %v1132_v3 = vadd.f32 %v1108_v50, %v321_v63  ;;  %v385_v4 = vpop.f32.mrb[3].mxu1 }
  0xec   : > { %880 = vpow2.f32 %v785_v59  ;;  %v799_v5 = vmul.f32 -1.442695, %v1121_v60  ;;  %v786_v6 = vmul.f32 -1.442695, %v1124_v61  ;;  %v1137_v7 = vadd.f32 %v1108_v50, %v385_v4 }
  0xed   : > { %882 = vpow2.f32 %v801_v0  ;;  %v802_v8 = vmul.f32 -1.442695, %v1129_v2  ;;  %v784_v9 = vmul.f32 -1.442695, %v1132_v3 }
  0xee   : > { %884 = vpow2.f32 %v783_v1  ;;  %v800_v10 = vmul.f32 -1.442695, %v1137_v7 }
  0xef   : > { %886 = vpow2.f32 %v799_v5  ;;  %v842_v11 = vpop.f32.mrb[4].mxu0 }
  0xf0   : > { %888 = vpow2.f32 %v786_v6  ;;  %v1143_v12 = vadd.f32 %v842_v11, %v1108_v50  ;;  %v858_v13 = vpop.f32.mrb[4].mxu1  ;;  %v334_v14 = vpop.f32.mrb[5].mxu0 }
  0xf1   : > { %890 = vpow2.f32 %v802_v8  ;;  %v1146_v15 = vadd.f32 %v858_v13, %v1108_v50  ;;  %v1149_v16 = vadd.f32 %v1108_v50, %v334_v14  ;;  %v398_v17 = vpop.f32.mrb[5].mxu1  ;;  %v843_v18 = vpop.f32.mrb[6].mxu0 }
  0xf2   : > { %892 = vpow2.f32 %v784_v9  ;;  %v789_v19 = vmul.f32 -1.442695, %v1143_v12  ;;  %v1153_v20 = vadd.f32 %v1108_v50, %v398_v17  ;;  %v1156_v21 = vadd.f32 %v843_v18, %v1108_v50  ;;  %v859_v22 = vpop.f32.mrb[6].mxu1  ;;  %v337_v23 = vpop.f32.mrb[7].mxu0 }
  0xf3   : > { %894 = vpow2.f32 %v800_v10  ;;  %v805_v24 = vmul.f32 -1.442695, %v1146_v15  ;;  %v787_v25 = vmul.f32 -1.442695, %v1149_v16  ;;  %v401_v26 = vpop.f32.mrb[7].mxu1  ;;  %v1167_v58 = vadd.f32 %v859_v22, %v1108_v50 }
  0xf4   : > { %896 = vpow2.f32 %v789_v19  ;;  %v803_v27 = vmul.f32 -1.442695, %v1153_v20  ;;  %v790_v28 = vmul.f32 -1.442695, %v1156_v21  ;;  %v1170_v63 = vadd.f32 %v1108_v50, %v337_v23 }
  0xf5   : > { %898 = vpow2.f32 %v805_v24  ;;  %v1173_v5 = vadd.f32 %v1108_v50, %v401_v26  ;;  %v806_v19 = vmul.f32 -1.442695, %v1167_v58 }
  0xf6   : > { %v881_v29 = vpop.eup %880  ;;  %900 = vpow2.f32 %v787_v25 }
  0xf7   : > { %v883_v30 = vpop.eup %882  ;;  %v543_v31 = vadd.f32 1.0, %v881_v29  ;;  %902 = vpow2.f32 %v803_v27  ;;  %v846_v32 = vpop.f32.mrb[8].mxu0  ;;  %v788_v27 = vmul.f32 -1.442695, %v1170_v63 }
  0xf8   : > { %v885_v33 = vpop.eup %884  ;;  %v559_v34 = vadd.f32 1.0, %v883_v30  ;;  %904 = vpow2.f32 %v790_v28  ;;  %v862_v35 = vpop.f32.mrb[8].mxu1  ;;  %v1178_v11 = vadd.f32 %v846_v32, %v1108_v50  ;;  %v804_v32 = vmul.f32 -1.442695, %v1173_v5 }
  0xf9   : > { %v350_v36 = vpop.f32.mrb[9].mxu0  ;;  %v887_v37 = vpop.eup %886  ;;  %906 = vrcp.f32 %v543_v31  ;;  %v541_v38 = vadd.f32 1.0, %v885_v33  ;;  %v1186_v22 = vadd.f32 %v862_v35, %v1108_v50 }
  0xfa   : > { %v414_v39 = vpop.f32.mrb[9].mxu1  ;;  %v847_v40 = vpop.f32.mrb[10].mxu0  ;;  %908 = vrcp.f32 %v559_v34  ;;  %v557_v42 = vadd.f32 1.0, %v887_v37  ;;  %v1201_v28 = vadd.f32 %v1108_v50, %v350_v36  ;;  %v793_v36 = vmul.f32 -1.442695, %v1178_v11 }
  0xfb   : > { %v889_v41 = vpop.eup %888  ;;  %v863_v43 = vpop.f32.mrb[10].mxu1  ;;  %910 = vrcp.f32 %v541_v38  ;;  %v1208_v33 = vadd.f32 %v1108_v50, %v414_v39  ;;  %v1213_v37 = vadd.f32 %v847_v40, %v1108_v50 }
  0xfc   : > { %v1162_v44 = vpop.f32.mrb[11].mxu0  ;;  %v891_v45 = vpop.eup %890  ;;  %v544_v46 = vadd.f32 1.0, %v889_v41  ;;  %912 = vrcp.f32 %v557_v42  ;;  %v809_v41 = vmul.f32 -1.442695, %v1186_v22  ;;  %v1219_v39 = vadd.f32 %v863_v43, %v1108_v50 }
  0xfd   : > { %v1164_v47 = vpop.f32.mrb[11].mxu1  ;;  %v893_v48 = vpop.eup %892  ;;  %v560_v49 = vadd.f32 1.0, %v891_v45  ;;  %v791_v40 = vmul.f32 -1.442695, %v1201_v28  ;;  %v1226_v45 = vadd.f32 %v1108_v50, %v1162_v44  ;;  %v807_v43 = vmul.f32 -1.442695, %v1208_v33 }
  0xfe   : > { %v895_v51 = vpop.eup %894  ;;  %914 = vrcp.f32 %v544_v46  ;;  %v542_v53 = vadd.f32 1.0, %v893_v48  ;;  %v1233_v48 = vadd.f32 %v1108_v50, %v1164_v47  ;;  %v794_v44 = vmul.f32 -1.442695, %v1213_v37 }
  0xff   : > { %v897_v54 = vpop.eup %896  ;;  %916 = vrcp.f32 %v560_v49  ;;  %v558_v57 = vadd.f32 1.0, %v895_v51  ;;  %v850_v0 = vpop.f32.mrb[12].mxu0  ;;  %v810_v47 = vmul.f32 -1.442695, %v1219_v39 }
 0x100   : > { %v899_v59 = vpop.eup %898  ;;  %918 = vrcp.f32 %v542_v53  ;;  %v547_v62 = vadd.f32 1.0, %v897_v54  ;;  %v866_v6 = vpop.f32.mrb[12].mxu1  ;;  %v1239_v51 = vadd.f32 %v850_v0, %v1108_v50 }
 0x101   : > { %v901_v1 = vpop.eup %900  ;;  %920 = vrcp.f32 %v558_v57  ;;  %v563_v4 = vadd.f32 1.0, %v899_v59  ;;  %v1175_v8 = vpop.f32.mrb[13].mxu0  ;;  %v1245_v54 = vadd.f32 %v866_v6, %v1108_v50  ;;  %v792_v59 = vmul.f32 -1.442695, %v1226_v45 }
 0x102   : > { %v903_v9 = vpop.eup %902  ;;  %922 = vrcp.f32 %v547_v62  ;;  %v545_v10 = vadd.f32 1.0, %v901_v1  ;;  %v1180_v13 = vpop.f32.mrb[13].mxu1 }
 0x103   : > { %v1182_v14 = vpop.f32.mrb[14].mxu0  ;;  %v905_v17 = vpop.eup %904  ;;  %924 = vrcp.f32 %v563_v4  ;;  %v561_v18 = vadd.f32 1.0, %v903_v9 }
 0x104   : > { %v1188_v23 = vpop.f32.mrb[14].mxu1  ;;  %v1190_v24 = vpop.f32.mrb[15].mxu0  ;;  %926 = vrcp.f32 %v545_v10  ;;  %v548_v26 = vadd.f32 1.0, %v905_v17 }
 0x105   : > { %v907_v25 = vpop.eup %906  ;;  %v1203_v29 = vpop.f32.mrb[15].mxu1  ;;  %928 = vrcp.f32 %v561_v18 }
 0x106   : > { %v909_v30 = vpop.eup %908  ;;  %v639_v31 = vmul.f32 %v907_v25, %v1111_v52  ;;  %930 = vrcp.f32 %v548_v26 }
 0x107   : > { %v911_v34 = vpop.eup %910  ;;  %v655_v35 = vmul.f32 %v909_v30, %v1114_v55  ;;  %932 = vpow2.f32 %v806_v19 }
 0x108   : > { %v913_v38 = vpop.eup %912  ;;  %671 = vst [vmem:[%s1197_s25 + $0x10] sm:$0xff] %v639_v31  ;;  %v637_v52 = vmul.f32 %v911_v34, %v1117_v56  ;;  %934 = vpow2.f32 %v788_v27 }
 0x109   : > { %v915_v42 = vpop.eup %914  ;;  %687 = vst [vmem:[%s1197_s25 + $0x90] sm:$0xff] %v655_v35  ;;  %v653_v55 = vmul.f32 %v913_v38, %v1121_v60  ;;  %936 = vpow2.f32 %v804_v32 }
 0x10a   : > { %v917_v56 = vpop.eup %916  ;;  %669 = vst [vmem:[%s1197_s25] sm:$0xff] %v637_v52  ;;  %v640_v46 = vmul.f32 %v915_v42, %v1124_v61  ;;  %938 = vpow2.f32 %v793_v36  ;;  %v1267_v42 = vadd.f32 %v1108_v50, %v1175_v8  ;;  %v1279_v8 = vadd.f32 %v1188_v23, %v1108_v50 }
 0x10b   : > { %v919_v60 = vpop.eup %918  ;;  %685 = vst [vmem:[%s1197_s25 + $0x80] sm:$0xff] %v653_v55  ;;  %v656_v49 = vmul.f32 %v917_v56, %v1129_v2  ;;  %940 = vpow2.f32 %v809_v41  ;;  %v1271_v56 = vadd.f32 %v1108_v50, %v1180_v13  ;;  %v1289_v23 = vadd.f32 %v1108_v50, %v1203_v29 }
 0x10c   : > { %v921_v61 = vpop.eup %920  ;;  %672 = vst [vmem:[%s1197_s25 + $0x18] sm:$0xff] %v640_v46  ;;  %v638_v53 = vmul.f32 %v919_v60, %v1132_v3  ;;  %942 = vpow2.f32 %v791_v40  ;;  %v808_v3 = vmul.f32 -1.442695, %v1233_v48  ;;  %v1275_v60 = vadd.f32 %v1182_v14, %v1108_v50 }
 0x10d   : > { %v923_v57 = vpop.eup %922  ;;  %688 = vst [vmem:[%s1197_s25 + $0x98] sm:$0xff] %v656_v49  ;;  %v654_v2 = vmul.f32 %v921_v61, %v1137_v7  ;;  %944 = vpow2.f32 %v807_v43  ;;  %v797_v7 = vmul.f32 -1.442695, %v1239_v51  ;;  %v795_v13 = vmul.f32 -1.442695, %v1267_v42 }
 0x10e   : > { %v925_v62 = vpop.eup %924  ;;  %670 = vst [vmem:[%s1197_s25 + $0x8] sm:$0xff] %v638_v53  ;;  %v643_v0 = vmul.f32 %v923_v57, %v1143_v12  ;;  %946 = vpow2.f32 %v794_v44  ;;  %v813_v12 = vmul.f32 -1.442695, %v1245_v54 }
 0x10f   : > { %v927_v1 = vpop.eup %926  ;;  %686 = vst [vmem:[%s1197_s25 + $0x88] sm:$0xff] %v654_v2  ;;  %v659_v4 = vmul.f32 %v925_v62, %v1146_v15  ;;  %948 = vpow2.f32 %v810_v47  ;;  %v1284_v47 = vadd.f32 %v1108_v50, %v1190_v24  ;;  %v811_v2 = vmul.f32 -1.442695, %v1271_v56 }
 0x110   : > { %v929_v6 = vpop.eup %928  ;;  %675 = vst [vmem:[%s1197_s25 + $0x30] sm:$0xff] %v643_v0  ;;  %v641_v9 = vmul.f32 %v927_v1, %v1149_v16  ;;  %950 = vpow2.f32 %v792_v59  ;;  %v798_v0 = vmul.f32 -1.442695, %v1275_v60  ;;  %v814_v1 = vmul.f32 -1.442695, %v1279_v8 }
 0x111   : > { %v931_v10 = vpop.eup %930  ;;  %691 = vst [vmem:[%s1197_s25 + $0xb0] sm:$0xff] %v659_v4  ;;  %v657_v17 = vmul.f32 %v929_v6, %v1153_v20  ;;  %952 = vpow2.f32 %v808_v3  ;;  %v796_v50 = vmul.f32 -1.442695, %v1284_v47 }
 0x112   : > { %v933_v18 = vpop.eup %932  ;;  %673 = vst [vmem:[%s1197_s25 + $0x20] sm:$0xff] %v641_v9  ;;  %v644_v15 = vmul.f32 %v931_v10, %v1156_v21  ;;  %954 = vpow2.f32 %v797_v7 }
 0x113   : > { %v935_v19 = vpop.eup %934  ;;  %689 = vst [vmem:[%s1197_s25 + $0xa0] sm:$0xff] %v657_v17  ;;  %v564_v25 = vadd.f32 1.0, %v933_v18  ;;  %956 = vpow2.f32 %v813_v12 }
 0x114   : > { %v937_v26 = vpop.eup %936  ;;  %676 = vst [vmem:[%s1197_s25 + $0x38] sm:$0xff] %v644_v15  ;;  %v546_v16 = vadd.f32 1.0, %v935_v19 }
 0x115   : > { %v939_v27 = vpop.eup %938  ;;  %958 = vrcp.f32 %v564_v25  ;;  %v562_v30 = vadd.f32 1.0, %v937_v26 }
 0x116   : > { %v941_v31 = vpop.eup %940  ;;  %960 = vrcp.f32 %v546_v16  ;;  %v551_v20 = vadd.f32 1.0, %v939_v27 }
 0x117   : > { %v943_v32 = vpop.eup %942  ;;  %962 = vrcp.f32 %v562_v30  ;;  %v567_v34 = vadd.f32 1.0, %v941_v31 }
 0x118   : > { %v945_v35 = vpop.eup %944  ;;  %964 = vrcp.f32 %v551_v20  ;;  %v549_v21 = vadd.f32 1.0, %v943_v32 }
 0x119   : > { %v947_v36 = vpop.eup %946  ;;  %966 = vrcp.f32 %v567_v34  ;;  %v565_v38 = vadd.f32 1.0, %v945_v35 }
 0x11a   : > { %v949_v52 = vpop.eup %948  ;;  %968 = vrcp.f32 %v549_v21  ;;  %v552_v41 = vadd.f32 1.0, %v947_v36 }
 0x11b   : > { %v951_v55 = vpop.eup %950  ;;  %970 = vrcp.f32 %v565_v38  ;;  %v568_v40 = vadd.f32 1.0, %v949_v52 }
 0x11c   : > { %v953_v46 = vpop.eup %952  ;;  %972 = vrcp.f32 %v552_v41  ;;  %v550_v43 = vadd.f32 1.0, %v951_v55 }
 0x11d   : > { %v955_v49 = vpop.eup %954  ;;  %974 = vrcp.f32 %v568_v40  ;;  %v566_v44 = vadd.f32 1.0, %v953_v46 }
 0x11e   : > { %v957_v61 = vpop.eup %956  ;;  %976 = vrcp.f32 %v550_v43  ;;  %v555_v53 = vadd.f32 1.0, %v955_v49 }
 0x11f   : > { %v959_v57 = vpop.eup %958  ;;  %978 = vrcp.f32 %v566_v44  ;;  %v571_v14 = vadd.f32 1.0, %v957_v61 }
 0x120   : > { %v961_v59 = vpop.eup %960  ;;  %v660_v62 = vmul.f32 %v959_v57, %v1167_v58  ;;  %980 = vrcp.f32 %v555_v53 }
 0x121   : > { %v963_v3 = vpop.eup %962  ;;  %v642_v24 = vmul.f32 %v961_v59, %v1170_v63  ;;  %982 = vrcp.f32 %v571_v14  ;;  %v812_v63 = vmul.f32 -1.442695, %v1289_v23 }
 0x122   : > { %v965_v4 = vpop.eup %964  ;;  %692 = vst [vmem:[%s1197_s25 + $0xb8] sm:$0xff] %v660_v62  ;;  %v658_v7 = vmul.f32 %v963_v3, %v1173_v5  ;;  %984 = vpow2.f32 %v795_v13 }
 0x123   : > { %v967_v58 = vpop.eup %966  ;;  %674 = vst [vmem:[%s1197_s25 + $0x28] sm:$0xff] %v642_v24  ;;  %v647_v29 = vmul.f32 %v965_v4, %v1178_v11  ;;  %986 = vpow2.f32 %v811_v2 }
 0x124   : > { %v969_v6 = vpop.eup %968  ;;  %690 = vst [vmem:[%s1197_s25 + $0xa8] sm:$0xff] %v658_v7  ;;  %v663_v9 = vmul.f32 %v967_v58, %v1186_v22  ;;  %988 = vpow2.f32 %v798_v0 }
 0x125   : > { %v971_v12 = vpop.eup %970  ;;  %679 = vst [vmem:[%s1197_s25 + $0x50] sm:$0xff] %v647_v29  ;;  %v645_v5 = vmul.f32 %v969_v6, %v1201_v28  ;;  %990 = vpow2.f32 %v814_v1 }
 0x126   : > { %v973_v10 = vpop.eup %972  ;;  %695 = vst [vmem:[%s1197_s25 + $0xd0] sm:$0xff] %v663_v9  ;;  %v661_v11 = vmul.f32 %v971_v12, %v1208_v33  ;;  %992 = vpow2.f32 %v796_v50 }
 0x127   : > { %v975_v17 = vpop.eup %974  ;;  %677 = vst [vmem:[%s1197_s25 + $0x40] sm:$0xff] %v645_v5  ;;  %v648_v18 = vmul.f32 %v973_v10, %v1213_v37  ;;  %994 = vpow2.f32 %v812_v63 }
 0x128   : > { %v977_v22 = vpop.eup %976  ;;  %693 = vst [vmem:[%s1197_s25 + $0xc0] sm:$0xff] %v661_v11  ;;  %v664_v15 = vmul.f32 %v975_v17, %v1219_v39 }
 0x129   : > { %v979_v28 = vpop.eup %978  ;;  %680 = vst [vmem:[%s1197_s25 + $0x58] sm:$0xff] %v648_v18  ;;  %v646_v19 = vmul.f32 %v977_v22, %v1226_v45 }
 0x12a   : > { %v981_v25 = vpop.eup %980  ;;  %696 = vst [vmem:[%s1197_s25 + $0xd8] sm:$0xff] %v664_v15  ;;  %v662_v33 = vmul.f32 %v979_v28, %v1233_v48 }
 0x12b   : > { %v983_v26 = vpop.eup %982  ;;  %678 = vst [vmem:[%s1197_s25 + $0x48] sm:$0xff] %v646_v19  ;;  %v651_v16 = vmul.f32 %v981_v25, %v1239_v51 }
 0x12c   : > { %v985_v37 = vpop.eup %984  ;;  %694 = vst [vmem:[%s1197_s25 + $0xc8] sm:$0xff] %v662_v33  ;;  %v667_v27 = vmul.f32 %v983_v26, %v1245_v54 }
 0x12d   : > { %v987_v30 = vpop.eup %986  ;;  %683 = vst [vmem:[%s1197_s25 + $0x70] sm:$0xff] %v651_v16  ;;  %v553_v39 = vadd.f32 1.0, %v985_v37 }
 0x12e   : > { %v989_v31 = vpop.eup %988  ;;  %699 = vst [vmem:[%s1197_s25 + $0xf0] sm:$0xff] %v667_v27  ;;  %v569_v20 = vadd.f32 1.0, %v987_v30 }
 0x12f   : > { %v991_v32 = vpop.eup %990  ;;  %996 = vrcp.f32 %v553_v39  ;;  %v556_v45 = vadd.f32 1.0, %v989_v31 }
 0x130   : > { %v993_v34 = vpop.eup %992  ;;  %998 = vrcp.f32 %v569_v20  ;;  %v572_v48 = vadd.f32 1.0, %v991_v32 }
 0x131   : > { %v995_v35 = vpop.eup %994  ;;  %1000 = vrcp.f32 %v556_v45  ;;  %v554_v51 = vadd.f32 1.0, %v993_v34 }
 0x132   : > { %1002 = vrcp.f32 %v572_v48  ;;  %v570_v54 = vadd.f32 1.0, %v995_v35 }
 0x133   : > { %1004 = vrcp.f32 %v554_v51 }
 0x134   : > { %1006 = vrcp.f32 %v570_v54 }
 0x139   : > { %v997_v21 = vpop.eup %996 }
 0x13a   : > { %v999_v36 = vpop.eup %998  ;;  %v649_v38 = vmul.f32 %v997_v21, %v1267_v42 }
 0x13b   : > { %v1001_v52 = vpop.eup %1000  ;;  %v665_v41 = vmul.f32 %v999_v36, %v1271_v56 }
 0x13c   : > { %v1003_v55 = vpop.eup %1002  ;;  %681 = vst [vmem:[%s1197_s25 + $0x60] sm:$0xff] %v649_v38  ;;  %v652_v40 = vmul.f32 %v1001_v52, %v1275_v60 }
 0x13d   : > { %v1005_v46 = vpop.eup %1004  ;;  %697 = vst [vmem:[%s1197_s25 + $0xe0] sm:$0xff] %v665_v41  ;;  %v668_v43 = vmul.f32 %v1003_v55, %v1279_v8 }
 0x13e   : > { %v1007_v49 = vpop.eup %1006  ;;  %684 = vst [vmem:[%s1197_s25 + $0x78] sm:$0xff] %v652_v40  ;;  %v650_v44 = vmul.f32 %v1005_v46, %v1284_v47 }
 0x13f   : > { %700 = vst [vmem:[%s1197_s25 + $0xf8] sm:$0xff] %v668_v43  ;;  %v666_v61 = vmul.f32 %v1007_v49, %v1289_v23 }
 0x140   : > { %682 = vst [vmem:[%s1197_s25 + $0x68] sm:$0xff] %v650_v44 }
 0x141   : > { %698 = vst [vmem:[%s1197_s25 + $0xe8] sm:$0xff] %v666_v61 }
 0x142 PF: > { %s13_s12 = sadd.s32 1, %s1014_s12  }
 0x143   : > { %p10_p4 = scmp.ge.s32.totalorder %s13_s12, 4  }
 0x145   :  { %12 = sbr.rel (!%p10_p4) target bundleno = 1 (0x1), region = 62 }

// kernel: c2f_forward.7
= control target key start
LH: loop header
LB: loop body
LE: loop exit
PB: predicated region body
PF: predicated region fallthrough
CT: control target
= control target key end

     0   :  { %s1044_s12 = smov 0   ;;  %s1344_s0 = inlined_call_operand.vmem [shape: f32[512,12], index: 0, kind: input, shape index: {}]   ;;  %s1345_s1 = inlined_call_operand.vmem [shape: bf16[12,128], index: 1, kind: input, shape index: {}]   ;;  %s1346_s2 = inlined_call_operand.vmem [shape: f32[1,128], index: 2, kind: input, shape index: {}]   ;;  %s1347_s3 = inlined_call_operand.vmem [shape: f32[512,128], index: 3, kind: output, shape index: {}]  }
   0x1 LB: > { %s763_s13 = sadd.s32 4294967295, %s1022_s12   ;;  %p767_p0 = scmp.ge.s32.totalorder %s1022_s12, 1  ;;  %s1022_s12 = sphi %s1044_s12, %s13_s12  }
   0x2   : > { %p138_p1 = scmp.lt.s32.totalorder %s1022_s12, 3 }
   0x4   : > { %p139_p2 = pnand %p767_p0, %p138_p1 }
   0x5   : > { %v887_v0 = vld [vmem:[%s1345_s1] sm:$0x3f] (!%p139_p2)   ;;  %vm286_vm0 = vcmask (!%p139_p2), 1045504   ;;  %s768_s16 = sshll.u32 (!%p139_p2), %s763_s13, 5  ;;  %vm237_vm1 = vcmask (!%p139_p2), 97280  }
   0x6   : > { %142 = sbr.rel (%p139_p2) target bundleno = 322 (0x142), region = 32  ;;  %877 = vmatprep.subr.msk.bf16.mxu0 (!%p139_p2), %vm286_vm0, %v887_v0  ;;  %878 = vmatprep.subr.msk.bf16.mxu1 (!%p139_p2), %vm286_vm0, %v887_v0  ;;  %v288_v1 = vsel (!%p139_p2), %vm286_vm0, %v887_v0, 0  ;;  %p163_p3 = scmp.lt.s32.totalorder (!%p139_p2), %s768_s16, 63  ;;  %v1116_v50 = vld [vmem:[%s1346_s2] ss:$0 sm:$0xff] (!%p139_p2) }
   0x7   : > { %842 = vmatpush3.bf16.msra.mxu0 (!%p139_p2), %v288_v1  ;;  %876 = vmatpush3.bf16.msra.mxu1 (!%p139_p2), %v288_v1 }
   0xd   : > { %s1349_s16 = smov (!%p163_p3, %s768_s16), 63 }
   0xe   : > { %s769_s17 = sshll.u32 %s1349_s16, 3 }
   0xf   : > { %s1063_s20 = scalar_lea.vmem %s1344_s0, %s769_s17  ;;  %s1205_s25 = scalar_lea.vmem %s1347_s3, %s769_s17 }
  0x10   : > { %v175_v2 = vld [vmem:[%s1063_s20] sm:$0xff]  ;;  %v176_v3 = vld [vmem:[%s1063_s20 + $0x8] sm:$0xff]  ;;  %v177_v7 = vld [vmem:[%s1063_s20 + $0x10] sm:$0xff] }
  0x11   : > { %v191_v4 = vld [vmem:[%s1063_s20 + $0x80] sm:$0xff]  ;;  %v207_v5 = vpack.c.bf16 %v176_v3, %v175_v2  ;;  %v192_v6 = vld [vmem:[%s1063_s20 + $0x88] sm:$0xff]  ;;  %v178_v8 = vld [vmem:[%s1063_s20 + $0x18] sm:$0xff] }
  0x12   : > { %v215_v9 = vpack.c.bf16 %v192_v6, %v191_v4  ;;  %v208_v10 = vpack.c.bf16 %v178_v8, %v177_v7  ;;  %v193_v11 = vld [vmem:[%s1063_s20 + $0x90] sm:$0xff]  ;;  %v194_v12 = vld [vmem:[%s1063_s20 + $0x98] sm:$0xff]  ;;  %v179_v13 = vld [vmem:[%s1063_s20 + $0x20] sm:$0xff] }
  0x13   : > { %843 = vmatprep.mubr.msk.bf16.mxu0 %vm237_vm1, %v207_v5  ;;  %v216_v14 = vpack.c.bf16 %v194_v12, %v193_v11  ;;  %v180_v15 = vld [vmem:[%s1063_s20 + $0x28] sm:$0xff]  ;;  %v195_v16 = vld [vmem:[%s1063_s20 + $0xa0] sm:$0xff]  ;;  %v181_v20 = vld [vmem:[%s1063_s20 + $0x30] sm:$0xff] }
  0x14   : > { %v196_v17 = vld [vmem:[%s1063_s20 + $0xa8] sm:$0xff]  ;;  %859 = vmatprep.mubr.msk.bf16.mxu1 %vm237_vm1, %v215_v9  ;;  %844 = vmatmul.mubr.msk.bf16.vlgmr.msra.gmra.mrb[0].mxu0 %vm237_vm1, %v208_v10  ;;  %v209_v18 = vpack.c.bf16 %v180_v15, %v179_v13  ;;  %v182_v21 = vld [vmem:[%s1063_s20 + $0x38] sm:$0xff]  ;;  %v197_v22 = vld [vmem:[%s1063_s20 + $0xb0] sm:$0xff] }
  0x15   : > { %v217_v19 = vpack.c.bf16 %v196_v17, %v195_v16  ;;  %860 = vmatmul.mubr.msk.bf16.vlgmr.msra.gmra.mrb[0].mxu1 %vm237_vm1, %v216_v14  ;;  %v198_v23 = vld [vmem:[%s1063_s20 + $0xb8] sm:$0xff]  ;;  %v183_v24 = vld [vmem:[%s1063_s20 + $0x40] sm:$0xff]  ;;  %v184_v25 = vld [vmem:[%s1063_s20 + $0x48] sm:$0xff]  ;;  %v210_v28 = vpack.c.bf16 %v182_v21, %v181_v20 }
  0x16   : > { %847 = vmatprep.mubr.msk.bf16.mxu0 %vm237_vm1, %v209_v18  ;;  %v199_v26 = vld [vmem:[%s1063_s20 + $0xc0] sm:$0xff]  ;;  %v200_v27 = vld [vmem:[%s1063_s20 + $0xc8] sm:$0xff]  ;;  %v218_v29 = vpack.c.bf16 %v198_v23, %v197_v22  ;;  %v211_v30 = vpack.c.bf16 %v184_v25, %v183_v24  ;;  %v185_v32 = vld [vmem:[%s1063_s20 + $0x50] sm:$0xff] }
  0x17   : > { %863 = vmatprep.mubr.msk.bf16.mxu1 %vm237_vm1, %v217_v19  ;;  %v219_v31 = vpack.c.bf16 %v200_v27, %v199_v26  ;;  %v186_v33 = vld [vmem:[%s1063_s20 + $0x58] sm:$0xff]  ;;  %v201_v34 = vld [vmem:[%s1063_s20 + $0xd0] sm:$0xff]  ;;  %v187_v36 = vld [vmem:[%s1063_s20 + $0x60] sm:$0xff] }
  0x18   : > { %v202_v35 = vld [vmem:[%s1063_s20 + $0xd8] sm:$0xff]  ;;  %v188_v37 = vld [vmem:[%s1063_s20 + $0x68] sm:$0xff]  ;;  %v203_v38 = vld [vmem:[%s1063_s20 + $0xe0] sm:$0xff]  ;;  %v212_v40 = vpack.c.bf16 %v186_v33, %v185_v32 }
  0x19   : > { %v204_v39 = vld [vmem:[%s1063_s20 + $0xe8] sm:$0xff]  ;;  %v220_v41 = vpack.c.bf16 %v202_v35, %v201_v34  ;;  %v213_v42 = vpack.c.bf16 %v188_v37, %v187_v36  ;;  %v189_v44 = vld [vmem:[%s1063_s20 + $0x70] sm:$0xff]  ;;  %v190_v45 = vld [vmem:[%s1063_s20 + $0x78] sm:$0xff] }
  0x1a   : > { %v221_v43 = vpack.c.bf16 %v204_v39, %v203_v38  ;;  %v205_v46 = vld [vmem:[%s1063_s20 + $0xf0] sm:$0xff]  ;;  %v206_v47 = vld [vmem:[%s1063_s20 + $0xf8] sm:$0xff]  ;;  %v214_v48 = vpack.c.bf16 %v190_v45, %v189_v44 }
  0x1b   : > { %v222_v49 = vpack.c.bf16 %v206_v47, %v205_v46 }
  0x1c   : > { %848 = vmatmul.mubr.msk.bf16.gmra.mrb[4].mxu0 %vm237_vm1, %v210_v28 }
  0x1d   : > { %864 = vmatmul.mubr.msk.bf16.gmra.mrb[4].mxu1 %vm237_vm1, %v218_v29  ;;  %851 = vmatprep.mubr.msk.bf16.mxu0 %vm237_vm1, %v211_v30 }
  0x1e   : > { %867 = vmatprep.mubr.msk.bf16.mxu1 %vm237_vm1, %v219_v31 }
  0x24   : > { %852 = vmatmul.mubr.msk.bf16.gmra.mrb[8].mxu0 %vm237_vm1, %v212_v40 }
  0x25   : > { %868 = vmatmul.mubr.msk.bf16.gmra.mrb[8].mxu1 %vm237_vm1, %v220_v41  ;;  %855 = vmatprep.mubr.msk.bf16.mxu0 %vm237_vm1, %v213_v42 }
  0x26   : > { %871 = vmatprep.mubr.msk.bf16.mxu1 %vm237_vm1, %v221_v43 }
  0x2c   : > { %856 = vmatmul.mubr.msk.bf16.gmra.mrb[12].mxu0 %vm237_vm1, %v214_v48 }
  0x2d   : > { %872 = vmatmul.mubr.msk.bf16.gmra.mrb[12].mxu1 %vm237_vm1, %v222_v49 }
  0xe7   : > { %v845_v51 = vpop.f32.mrb[0].mxu0 }
  0xe8   : > { %v1119_v52 = vadd.f32 %v845_v51, %v1116_v50  ;;  %v861_v53 = vpop.f32.mrb[0].mxu1  ;;  %v324_v54 = vpop.f32.mrb[1].mxu0 }
  0xe9   : > { %v1122_v55 = vadd.f32 %v861_v53, %v1116_v50  ;;  %v1125_v56 = vadd.f32 %v1116_v50, %v324_v54  ;;  %v388_v57 = vpop.f32.mrb[1].mxu1  ;;  %v846_v58 = vpop.f32.mrb[2].mxu0 }
  0xea   : > { %v792_v59 = vmul.f32 -1.442695, %v1119_v52  ;;  %v1129_v60 = vadd.f32 %v1116_v50, %v388_v57  ;;  %v1132_v61 = vadd.f32 %v846_v58, %v1116_v50  ;;  %v862_v62 = vpop.f32.mrb[2].mxu1  ;;  %v327_v63 = vpop.f32.mrb[3].mxu0 }
  0xeb   : > { %v808_v0 = vmul.f32 -1.442695, %v1122_v55  ;;  %v790_v1 = vmul.f32 -1.442695, %v1125_v56  ;;  %v1137_v2 = vadd.f32 %v862_v62, %v1116_v50  ;;  %v1140_v3 = vadd.f32 %v1116_v50, %v327_v63  ;;  %v391_v4 = vpop.f32.mrb[3].mxu1 }
  0xec   : > { %888 = vpow2.f32 %v792_v59  ;;  %v806_v5 = vmul.f32 -1.442695, %v1129_v60  ;;  %v793_v6 = vmul.f32 -1.442695, %v1132_v61  ;;  %v1145_v7 = vadd.f32 %v1116_v50, %v391_v4 }
  0xed   : > { %890 = vpow2.f32 %v808_v0  ;;  %v809_v8 = vmul.f32 -1.442695, %v1137_v2  ;;  %v791_v9 = vmul.f32 -1.442695, %v1140_v3 }
  0xee   : > { %892 = vpow2.f32 %v790_v1  ;;  %v807_v10 = vmul.f32 -1.442695, %v1145_v7 }
  0xef   : > { %894 = vpow2.f32 %v806_v5  ;;  %v849_v11 = vpop.f32.mrb[4].mxu0 }
  0xf0   : > { %896 = vpow2.f32 %v793_v6  ;;  %v1151_v12 = vadd.f32 %v849_v11, %v1116_v50  ;;  %v865_v13 = vpop.f32.mrb[4].mxu1  ;;  %v340_v14 = vpop.f32.mrb[5].mxu0 }
  0xf1   : > { %898 = vpow2.f32 %v809_v8  ;;  %v1154_v15 = vadd.f32 %v865_v13, %v1116_v50  ;;  %v1157_v16 = vadd.f32 %v1116_v50, %v340_v14  ;;  %v404_v17 = vpop.f32.mrb[5].mxu1  ;;  %v850_v18 = vpop.f32.mrb[6].mxu0 }
  0xf2   : > { %900 = vpow2.f32 %v791_v9  ;;  %v796_v19 = vmul.f32 -1.442695, %v1151_v12  ;;  %v1161_v20 = vadd.f32 %v1116_v50, %v404_v17  ;;  %v1164_v21 = vadd.f32 %v850_v18, %v1116_v50  ;;  %v866_v22 = vpop.f32.mrb[6].mxu1  ;;  %v343_v23 = vpop.f32.mrb[7].mxu0 }
  0xf3   : > { %902 = vpow2.f32 %v807_v10  ;;  %v812_v24 = vmul.f32 -1.442695, %v1154_v15  ;;  %v794_v25 = vmul.f32 -1.442695, %v1157_v16  ;;  %v407_v26 = vpop.f32.mrb[7].mxu1  ;;  %v1175_v58 = vadd.f32 %v866_v22, %v1116_v50 }
  0xf4   : > { %904 = vpow2.f32 %v796_v19  ;;  %v810_v27 = vmul.f32 -1.442695, %v1161_v20  ;;  %v797_v28 = vmul.f32 -1.442695, %v1164_v21  ;;  %v1178_v63 = vadd.f32 %v1116_v50, %v343_v23 }
  0xf5   : > { %906 = vpow2.f32 %v812_v24  ;;  %v1181_v5 = vadd.f32 %v1116_v50, %v407_v26  ;;  %v813_v19 = vmul.f32 -1.442695, %v1175_v58 }
  0xf6   : > { %v889_v29 = vpop.eup %888  ;;  %908 = vpow2.f32 %v794_v25 }
  0xf7   : > { %v891_v30 = vpop.eup %890  ;;  %v549_v31 = vadd.f32 1.0, %v889_v29  ;;  %910 = vpow2.f32 %v810_v27  ;;  %v853_v32 = vpop.f32.mrb[8].mxu0  ;;  %v795_v27 = vmul.f32 -1.442695, %v1178_v63 }
  0xf8   : > { %v893_v33 = vpop.eup %892  ;;  %v565_v34 = vadd.f32 1.0, %v891_v30  ;;  %912 = vpow2.f32 %v797_v28  ;;  %v869_v35 = vpop.f32.mrb[8].mxu1  ;;  %v1186_v11 = vadd.f32 %v853_v32, %v1116_v50  ;;  %v811_v32 = vmul.f32 -1.442695, %v1181_v5 }
  0xf9   : > { %v356_v36 = vpop.f32.mrb[9].mxu0  ;;  %v895_v37 = vpop.eup %894  ;;  %914 = vrcp.f32 %v549_v31  ;;  %v547_v38 = vadd.f32 1.0, %v893_v33  ;;  %v1194_v22 = vadd.f32 %v869_v35, %v1116_v50 }
  0xfa   : > { %v420_v39 = vpop.f32.mrb[9].mxu1  ;;  %v854_v40 = vpop.f32.mrb[10].mxu0  ;;  %916 = vrcp.f32 %v565_v34  ;;  %v563_v42 = vadd.f32 1.0, %v895_v37  ;;  %v1209_v28 = vadd.f32 %v1116_v50, %v356_v36  ;;  %v800_v36 = vmul.f32 -1.442695, %v1186_v11 }
  0xfb   : > { %v897_v41 = vpop.eup %896  ;;  %v870_v43 = vpop.f32.mrb[10].mxu1  ;;  %918 = vrcp.f32 %v547_v38  ;;  %v1216_v33 = vadd.f32 %v1116_v50, %v420_v39  ;;  %v1221_v37 = vadd.f32 %v854_v40, %v1116_v50 }
  0xfc   : > { %v1170_v44 = vpop.f32.mrb[11].mxu0  ;;  %v899_v45 = vpop.eup %898  ;;  %v550_v46 = vadd.f32 1.0, %v897_v41  ;;  %920 = vrcp.f32 %v563_v42  ;;  %v816_v41 = vmul.f32 -1.442695, %v1194_v22  ;;  %v1227_v39 = vadd.f32 %v870_v43, %v1116_v50 }
  0xfd   : > { %v1172_v47 = vpop.f32.mrb[11].mxu1  ;;  %v901_v48 = vpop.eup %900  ;;  %v566_v49 = vadd.f32 1.0, %v899_v45  ;;  %v798_v40 = vmul.f32 -1.442695, %v1209_v28  ;;  %v1234_v45 = vadd.f32 %v1116_v50, %v1170_v44  ;;  %v814_v43 = vmul.f32 -1.442695, %v1216_v33 }
  0xfe   : > { %v903_v51 = vpop.eup %902  ;;  %922 = vrcp.f32 %v550_v46  ;;  %v548_v53 = vadd.f32 1.0, %v901_v48  ;;  %v1241_v48 = vadd.f32 %v1116_v50, %v1172_v47  ;;  %v801_v44 = vmul.f32 -1.442695, %v1221_v37 }
  0xff   : > { %v905_v54 = vpop.eup %904  ;;  %924 = vrcp.f32 %v566_v49  ;;  %v564_v57 = vadd.f32 1.0, %v903_v51  ;;  %v857_v0 = vpop.f32.mrb[12].mxu0  ;;  %v817_v47 = vmul.f32 -1.442695, %v1227_v39 }
 0x100   : > { %v907_v59 = vpop.eup %906  ;;  %926 = vrcp.f32 %v548_v53  ;;  %v553_v62 = vadd.f32 1.0, %v905_v54  ;;  %v873_v6 = vpop.f32.mrb[12].mxu1  ;;  %v1247_v51 = vadd.f32 %v857_v0, %v1116_v50 }
 0x101   : > { %v909_v1 = vpop.eup %908  ;;  %928 = vrcp.f32 %v564_v57  ;;  %v569_v4 = vadd.f32 1.0, %v907_v59  ;;  %v1183_v8 = vpop.f32.mrb[13].mxu0  ;;  %v1253_v54 = vadd.f32 %v873_v6, %v1116_v50  ;;  %v799_v59 = vmul.f32 -1.442695, %v1234_v45 }
 0x102   : > { %v911_v9 = vpop.eup %910  ;;  %930 = vrcp.f32 %v553_v62  ;;  %v551_v10 = vadd.f32 1.0, %v909_v1  ;;  %v1188_v13 = vpop.f32.mrb[13].mxu1 }
 0x103   : > { %v1190_v14 = vpop.f32.mrb[14].mxu0  ;;  %v913_v17 = vpop.eup %912  ;;  %932 = vrcp.f32 %v569_v4  ;;  %v567_v18 = vadd.f32 1.0, %v911_v9 }
 0x104   : > { %v1196_v23 = vpop.f32.mrb[14].mxu1  ;;  %v1198_v24 = vpop.f32.mrb[15].mxu0  ;;  %934 = vrcp.f32 %v551_v10  ;;  %v554_v26 = vadd.f32 1.0, %v913_v17 }
 0x105   : > { %v915_v25 = vpop.eup %914  ;;  %v1211_v29 = vpop.f32.mrb[15].mxu1  ;;  %936 = vrcp.f32 %v567_v18 }
 0x106   : > { %v917_v30 = vpop.eup %916  ;;  %v645_v31 = vmul.f32 %v915_v25, %v1119_v52  ;;  %938 = vrcp.f32 %v554_v26 }
 0x107   : > { %v919_v34 = vpop.eup %918  ;;  %v661_v35 = vmul.f32 %v917_v30, %v1122_v55  ;;  %940 = vpow2.f32 %v813_v19 }
 0x108   : > { %v921_v38 = vpop.eup %920  ;;  %677 = vst [vmem:[%s1205_s25 + $0x10] sm:$0xff] %v645_v31  ;;  %v643_v52 = vmul.f32 %v919_v34, %v1125_v56  ;;  %942 = vpow2.f32 %v795_v27 }
 0x109   : > { %v923_v42 = vpop.eup %922  ;;  %693 = vst [vmem:[%s1205_s25 + $0x90] sm:$0xff] %v661_v35  ;;  %v659_v55 = vmul.f32 %v921_v38, %v1129_v60  ;;  %944 = vpow2.f32 %v811_v32 }
 0x10a   : > { %v925_v56 = vpop.eup %924  ;;  %675 = vst [vmem:[%s1205_s25] sm:$0xff] %v643_v52  ;;  %v646_v46 = vmul.f32 %v923_v42, %v1132_v61  ;;  %946 = vpow2.f32 %v800_v36  ;;  %v1275_v42 = vadd.f32 %v1116_v50, %v1183_v8  ;;  %v1287_v8 = vadd.f32 %v1196_v23, %v1116_v50 }
 0x10b   : > { %v927_v60 = vpop.eup %926  ;;  %691 = vst [vmem:[%s1205_s25 + $0x80] sm:$0xff] %v659_v55  ;;  %v662_v49 = vmul.f32 %v925_v56, %v1137_v2  ;;  %948 = vpow2.f32 %v816_v41  ;;  %v1279_v56 = vadd.f32 %v1116_v50, %v1188_v13  ;;  %v1297_v23 = vadd.f32 %v1116_v50, %v1211_v29 }
 0x10c   : > { %v929_v61 = vpop.eup %928  ;;  %678 = vst [vmem:[%s1205_s25 + $0x18] sm:$0xff] %v646_v46  ;;  %v644_v53 = vmul.f32 %v927_v60, %v1140_v3  ;;  %950 = vpow2.f32 %v798_v40  ;;  %v815_v3 = vmul.f32 -1.442695, %v1241_v48  ;;  %v1283_v60 = vadd.f32 %v1190_v14, %v1116_v50 }
 0x10d   : > { %v931_v57 = vpop.eup %930  ;;  %694 = vst [vmem:[%s1205_s25 + $0x98] sm:$0xff] %v662_v49  ;;  %v660_v2 = vmul.f32 %v929_v61, %v1145_v7  ;;  %952 = vpow2.f32 %v814_v43  ;;  %v804_v7 = vmul.f32 -1.442695, %v1247_v51  ;;  %v802_v13 = vmul.f32 -1.442695, %v1275_v42 }
 0x10e   : > { %v933_v62 = vpop.eup %932  ;;  %676 = vst [vmem:[%s1205_s25 + $0x8] sm:$0xff] %v644_v53  ;;  %v649_v0 = vmul.f32 %v931_v57, %v1151_v12  ;;  %954 = vpow2.f32 %v801_v44  ;;  %v820_v12 = vmul.f32 -1.442695, %v1253_v54 }
 0x10f   : > { %v935_v1 = vpop.eup %934  ;;  %692 = vst [vmem:[%s1205_s25 + $0x88] sm:$0xff] %v660_v2  ;;  %v665_v4 = vmul.f32 %v933_v62, %v1154_v15  ;;  %956 = vpow2.f32 %v817_v47  ;;  %v1292_v47 = vadd.f32 %v1116_v50, %v1198_v24  ;;  %v818_v2 = vmul.f32 -1.442695, %v1279_v56 }
 0x110   : > { %v937_v6 = vpop.eup %936  ;;  %681 = vst [vmem:[%s1205_s25 + $0x30] sm:$0xff] %v649_v0  ;;  %v647_v9 = vmul.f32 %v935_v1, %v1157_v16  ;;  %958 = vpow2.f32 %v799_v59  ;;  %v805_v0 = vmul.f32 -1.442695, %v1283_v60  ;;  %v821_v1 = vmul.f32 -1.442695, %v1287_v8 }
 0x111   : > { %v939_v10 = vpop.eup %938  ;;  %697 = vst [vmem:[%s1205_s25 + $0xb0] sm:$0xff] %v665_v4  ;;  %v663_v17 = vmul.f32 %v937_v6, %v1161_v20  ;;  %960 = vpow2.f32 %v815_v3  ;;  %v803_v50 = vmul.f32 -1.442695, %v1292_v47 }
 0x112   : > { %v941_v18 = vpop.eup %940  ;;  %679 = vst [vmem:[%s1205_s25 + $0x20] sm:$0xff] %v647_v9  ;;  %v650_v15 = vmul.f32 %v939_v10, %v1164_v21  ;;  %962 = vpow2.f32 %v804_v7 }
 0x113   : > { %v943_v19 = vpop.eup %942  ;;  %695 = vst [vmem:[%s1205_s25 + $0xa0] sm:$0xff] %v663_v17  ;;  %v570_v25 = vadd.f32 1.0, %v941_v18  ;;  %964 = vpow2.f32 %v820_v12 }
 0x114   : > { %v945_v26 = vpop.eup %944  ;;  %682 = vst [vmem:[%s1205_s25 + $0x38] sm:$0xff] %v650_v15  ;;  %v552_v16 = vadd.f32 1.0, %v943_v19 }
 0x115   : > { %v947_v27 = vpop.eup %946  ;;  %966 = vrcp.f32 %v570_v25  ;;  %v568_v30 = vadd.f32 1.0, %v945_v26 }
 0x116   : > { %v949_v31 = vpop.eup %948  ;;  %968 = vrcp.f32 %v552_v16  ;;  %v557_v20 = vadd.f32 1.0, %v947_v27 }
 0x117   : > { %v951_v32 = vpop.eup %950  ;;  %970 = vrcp.f32 %v568_v30  ;;  %v573_v34 = vadd.f32 1.0, %v949_v31 }
 0x118   : > { %v953_v35 = vpop.eup %952  ;;  %972 = vrcp.f32 %v557_v20  ;;  %v555_v21 = vadd.f32 1.0, %v951_v32 }
 0x119   : > { %v955_v36 = vpop.eup %954  ;;  %974 = vrcp.f32 %v573_v34  ;;  %v571_v38 = vadd.f32 1.0, %v953_v35 }
 0x11a   : > { %v957_v52 = vpop.eup %956  ;;  %976 = vrcp.f32 %v555_v21  ;;  %v558_v41 = vadd.f32 1.0, %v955_v36 }
 0x11b   : > { %v959_v55 = vpop.eup %958  ;;  %978 = vrcp.f32 %v571_v38  ;;  %v574_v40 = vadd.f32 1.0, %v957_v52 }
 0x11c   : > { %v961_v46 = vpop.eup %960  ;;  %980 = vrcp.f32 %v558_v41  ;;  %v556_v43 = vadd.f32 1.0, %v959_v55 }
 0x11d   : > { %v963_v49 = vpop.eup %962  ;;  %982 = vrcp.f32 %v574_v40  ;;  %v572_v44 = vadd.f32 1.0, %v961_v46 }
 0x11e   : > { %v965_v61 = vpop.eup %964  ;;  %984 = vrcp.f32 %v556_v43  ;;  %v561_v53 = vadd.f32 1.0, %v963_v49 }
 0x11f   : > { %v967_v57 = vpop.eup %966  ;;  %986 = vrcp.f32 %v572_v44  ;;  %v577_v14 = vadd.f32 1.0, %v965_v61 }
 0x120   : > { %v969_v59 = vpop.eup %968  ;;  %v666_v62 = vmul.f32 %v967_v57, %v1175_v58  ;;  %988 = vrcp.f32 %v561_v53 }
 0x121   : > { %v971_v3 = vpop.eup %970  ;;  %v648_v24 = vmul.f32 %v969_v59, %v1178_v63  ;;  %990 = vrcp.f32 %v577_v14  ;;  %v819_v63 = vmul.f32 -1.442695, %v1297_v23 }
 0x122   : > { %v973_v4 = vpop.eup %972  ;;  %698 = vst [vmem:[%s1205_s25 + $0xb8] sm:$0xff] %v666_v62  ;;  %v664_v7 = vmul.f32 %v971_v3, %v1181_v5  ;;  %992 = vpow2.f32 %v802_v13 }
 0x123   : > { %v975_v58 = vpop.eup %974  ;;  %680 = vst [vmem:[%s1205_s25 + $0x28] sm:$0xff] %v648_v24  ;;  %v653_v29 = vmul.f32 %v973_v4, %v1186_v11  ;;  %994 = vpow2.f32 %v818_v2 }
 0x124   : > { %v977_v6 = vpop.eup %976  ;;  %696 = vst [vmem:[%s1205_s25 + $0xa8] sm:$0xff] %v664_v7  ;;  %v669_v9 = vmul.f32 %v975_v58, %v1194_v22  ;;  %996 = vpow2.f32 %v805_v0 }
 0x125   : > { %v979_v12 = vpop.eup %978  ;;  %685 = vst [vmem:[%s1205_s25 + $0x50] sm:$0xff] %v653_v29  ;;  %v651_v5 = vmul.f32 %v977_v6, %v1209_v28  ;;  %998 = vpow2.f32 %v821_v1 }
 0x126   : > { %v981_v10 = vpop.eup %980  ;;  %701 = vst [vmem:[%s1205_s25 + $0xd0] sm:$0xff] %v669_v9  ;;  %v667_v11 = vmul.f32 %v979_v12, %v1216_v33  ;;  %1000 = vpow2.f32 %v803_v50 }
 0x127   : > { %v983_v17 = vpop.eup %982  ;;  %683 = vst [vmem:[%s1205_s25 + $0x40] sm:$0xff] %v651_v5  ;;  %v654_v18 = vmul.f32 %v981_v10, %v1221_v37  ;;  %1002 = vpow2.f32 %v819_v63 }
 0x128   : > { %v985_v22 = vpop.eup %984  ;;  %699 = vst [vmem:[%s1205_s25 + $0xc0] sm:$0xff] %v667_v11  ;;  %v670_v15 = vmul.f32 %v983_v17, %v1227_v39 }
 0x129   : > { %v987_v28 = vpop.eup %986  ;;  %686 = vst [vmem:[%s1205_s25 + $0x58] sm:$0xff] %v654_v18  ;;  %v652_v19 = vmul.f32 %v985_v22, %v1234_v45 }
 0x12a   : > { %v989_v25 = vpop.eup %988  ;;  %702 = vst [vmem:[%s1205_s25 + $0xd8] sm:$0xff] %v670_v15  ;;  %v668_v33 = vmul.f32 %v987_v28, %v1241_v48 }
 0x12b   : > { %v991_v26 = vpop.eup %990  ;;  %684 = vst [vmem:[%s1205_s25 + $0x48] sm:$0xff] %v652_v19  ;;  %v657_v16 = vmul.f32 %v989_v25, %v1247_v51 }
 0x12c   : > { %v993_v37 = vpop.eup %992  ;;  %700 = vst [vmem:[%s1205_s25 + $0xc8] sm:$0xff] %v668_v33  ;;  %v673_v27 = vmul.f32 %v991_v26, %v1253_v54 }
 0x12d   : > { %v995_v30 = vpop.eup %994  ;;  %689 = vst [vmem:[%s1205_s25 + $0x70] sm:$0xff] %v657_v16  ;;  %v559_v39 = vadd.f32 1.0, %v993_v37 }
 0x12e   : > { %v997_v31 = vpop.eup %996  ;;  %705 = vst [vmem:[%s1205_s25 + $0xf0] sm:$0xff] %v673_v27  ;;  %v575_v20 = vadd.f32 1.0, %v995_v30 }
 0x12f   : > { %v999_v32 = vpop.eup %998  ;;  %1004 = vrcp.f32 %v559_v39  ;;  %v562_v45 = vadd.f32 1.0, %v997_v31 }
 0x130   : > { %v1001_v34 = vpop.eup %1000  ;;  %1006 = vrcp.f32 %v575_v20  ;;  %v578_v48 = vadd.f32 1.0, %v999_v32 }
 0x131   : > { %v1003_v35 = vpop.eup %1002  ;;  %1008 = vrcp.f32 %v562_v45  ;;  %v560_v51 = vadd.f32 1.0, %v1001_v34 }
 0x132   : > { %1010 = vrcp.f32 %v578_v48  ;;  %v576_v54 = vadd.f32 1.0, %v1003_v35 }
 0x133   : > { %1012 = vrcp.f32 %v560_v51 }
 0x134   : > { %1014 = vrcp.f32 %v576_v54 }
 0x139   : > { %v1005_v21 = vpop.eup %1004 }
 0x13a   : > { %v1007_v36 = vpop.eup %1006  ;;  %v655_v38 = vmul.f32 %v1005_v21, %v1275_v42 }
 0x13b   : > { %v1009_v52 = vpop.eup %1008  ;;  %v671_v41 = vmul.f32 %v1007_v36, %v1279_v56 }
 0x13c   : > { %v1011_v55 = vpop.eup %1010  ;;  %687 = vst [vmem:[%s1205_s25 + $0x60] sm:$0xff] %v655_v38  ;;  %v658_v40 = vmul.f32 %v1009_v52, %v1283_v60 }
 0x13d   : > { %v1013_v46 = vpop.eup %1012  ;;  %703 = vst [vmem:[%s1205_s25 + $0xe0] sm:$0xff] %v671_v41  ;;  %v674_v43 = vmul.f32 %v1011_v55, %v1287_v8 }
 0x13e   : > { %v1015_v49 = vpop.eup %1014  ;;  %690 = vst [vmem:[%s1205_s25 + $0x78] sm:$0xff] %v658_v40  ;;  %v656_v44 = vmul.f32 %v1013_v46, %v1292_v47 }
 0x13f   : > { %706 = vst [vmem:[%s1205_s25 + $0xf8] sm:$0xff] %v674_v43  ;;  %v672_v61 = vmul.f32 %v1015_v49, %v1297_v23 }
 0x140   : > { %688 = vst [vmem:[%s1205_s25 + $0x68] sm:$0xff] %v656_v44 }
 0x141   : > { %704 = vst [vmem:[%s1205_s25 + $0xe8] sm:$0xff] %v672_v61 }
 0x142 PF: > { %s13_s12 = sadd.s32 1, %s1022_s12  }
 0x143   : > { %p10_p4 = scmp.ge.s32.totalorder %s13_s12, 4  }
 0x145   :  { %12 = sbr.rel (!%p10_p4) target bundleno = 1 (0x1), region = 62 }

// kernel: c2f_forward.5
= control target key start
LH: loop header
LB: loop body
LE: loop exit
PB: predicated region body
PF: predicated region fallthrough
CT: control target
= control target key end

     0   :  { %s4493_s12 = smov 0   ;;  %s4495_s13 = smov 0   ;;  %s5291_s0 = inlined_call_operand.vmem [shape: f32[2,18,18,4], index: 0, kind: input, shape index: {}]   ;;  %s5292_s1 = inlined_call_operand.vmem [shape: bf16[3,3,4,128], index: 1, kind: input, shape index: {}]   ;;  %s5293_s2 = inlined_call_operand.vmem [shape: f32[1,128], index: 2, kind: input, shape index: {}]   ;;  %s5294_s3 = inlined_call_operand.vmem [shape: f32[2,16,16,128], index: 3, kind: output, shape index: {}]  }
   0x1   :  { %s4497_s14 = smov 0  }
   0x2 LB: > { %s25_s15 = sadd.s32 1, %s4467_s13  ;;  %p3185_p0 = scmp.ge.s32.totalorder %s4471_s14, 1  ;;  %s4471_s14 = sphi %s4497_s14, %s13_s14   ;;  %s4467_s13 = sphi %s4495_s13, %s5296_s13   ;;  %s4463_s12 = sphi %s4493_s12, %s5295_s12  }
   0x3   : > { %p27_p1 = scmp.ge.s32.totalorder %s25_s15, 2  ;;  %p151_p2 = scmp.lt.s32.totalorder %s4471_s14, 3 }
   0x5   : > { %s5298_s15 = smov (%p27_p1, %s25_s15), 0  ;;  %p152_p3 = pnand %p3185_p0, %p151_p2 }
   0x6   : > { %v3189_v0 = vld [vmem:[%s5292_s1 + $0x2] sm:$0x3] (!%p152_p3)  ;;  %vm348_vm0 = vcmask (!%p152_p3), 1041408   ;;  %v4517_v1 = vld [vmem:[%s5292_s1 + $0x8] sm:$0x3] (!%p152_p3)  ;;  %p180_p4 = scmp.lt.s32.totalorder (!%p152_p3), %s4463_s12, 1 }
   0x7   : > { %155 = sbr.rel (%p152_p3) target bundleno = 556 (0x22c), region = 32  ;;  %4286 = vmatprep.subr.msk.bf16.mxu1 (!%p152_p3), %vm348_vm0, %v3189_v0  ;;  %4290 = vmatprep.subr.msk.bf16.mxu0 (!%p152_p3), %vm348_vm0, %v4517_v1  ;;  %v350_v2 = vsel (!%p152_p3), %vm348_vm0, %v3189_v0, 0  ;;  %v4525_v3 = vsel (!%p152_p3), %vm348_vm0, %v4517_v1, 0  ;;  %v248_v4 = vld [vmem:[%s5292_s1] sm:$0x3] (!%p152_p3)  ;;  %vm299_vm1 = vcmask (!%p152_p3), 31744  }
   0x8   : > { %3723 = vmatpush3.bf16.msra.mxu1 (!%p152_p3), %v350_v2  ;;  %3859 = vmatpush3.bf16.msra.mxu0 (!%p152_p3), %v4525_v3  ;;  %v3369_v5 = vld [vmem:[%s5292_s1 + $0xa] sm:$0x3] (!%p152_p3)  ;;  %v562_v14 = vsel (!%p152_p3), %vm348_vm0, %v248_v4, 0  ;;  %v3418_v20 = vld [vmem:[%s5292_s1 + $0xc] sm:$0x3] (!%p152_p3) }
   0x9   : > { %4287 = vmatprep.subr.msk.bf16.mxu1 (!%p152_p3), %vm348_vm0, %v248_v4  ;;  %4292 = vmatprep.subr.msk.bf16.mxu0 (!%p152_p3), %vm348_vm0, %v3369_v5  ;;  %v1709_v18 = vsel (!%p152_p3), %vm348_vm0, %v3369_v5, 0  ;;  %v4569_v21 = vld [vmem:[%s5292_s1 + $0x4] sm:$0x3] (!%p152_p3)  ;;  %v2006_v52 = vsel (!%p152_p3), %vm348_vm0, %v3418_v20, 0  ;;  %v4648_v53 = vld [vmem:[%s5292_s1 + $0xe] sm:$0x3] (!%p152_p3) }
   0xe   : > { %s5300_s12 = smov (!%p180_p4, %s4463_s12), 1 }
   0xf   : > { %s4296_s24 = smul.u32 432, %s5300_s12  ;;  %s3568_s17 = sshll.u32 %s5300_s12, 8 }
  0x10   : > { %s5146_s19 = scalar_lea.vmem %s5294_s3, %s3568_s17 }
  0x11   : > { %s4542_s27 = scalar_lea.vmem %s5291_s0, %s4296_s24 }
  0x12   : > { %v249_v6 = vld [vmem:[%s4542_s27 + $0x1] sm:$0xff]  ;;  %v250_v7 = vld [vmem:[%s4542_s27 + $0x9] sm:$0xff]  ;;  %v3288_v8 = vld [vmem:[%s4542_s27 + $0x19] sm:$0xff] }
  0x13   : > { %v281_v9 = vpack.c.bf16 %v250_v7, %v249_v6  ;;  %v3289_v10 = vld [vmem:[%s4542_s27 + $0x21] sm:$0xff]  ;;  %v3290_v11 = vld [vmem:[%s4542_s27 + $0x31] sm:$0xff]  ;;  %v3291_v12 = vld [vmem:[%s4542_s27 + $0x39] sm:$0xff] }
  0x14   : > { %v1348_v13 = vpack.c.bf16 %v3289_v10, %v3288_v8  ;;  %v4551_v15 = vpack.c.bf16 %v3291_v12, %v3290_v11  ;;  %v3292_v16 = vld [vmem:[%s4542_s27 + $0x49] sm:$0xff]  ;;  %v3293_v17 = vld [vmem:[%s4542_s27 + $0x51] sm:$0xff]  ;;  %v3294_v22 = vld [vmem:[%s4542_s27 + $0x61] sm:$0xff] }
  0x15   : > { %3724 = vmatprep.mubr.msk.bf16.mxu1 %vm299_vm1, %v281_v9  ;;  %v4557_v19 = vpack.c.bf16 %v3293_v17, %v3292_v16  ;;  %v3295_v23 = vld [vmem:[%s4542_s27 + $0x69] sm:$0xff]  ;;  %v3296_v24 = vld [vmem:[%s4542_s27 + $0x79] sm:$0xff]  ;;  %v3297_v25 = vld [vmem:[%s4542_s27 + $0x81] sm:$0xff] }
  0x16   : > { %3860 = vmatprep.mubr.msk.bf16.mxu0 %vm299_vm1, %v1348_v13  ;;  %3725 = vmatmul.mubr.msk.bf16.vlgmr.msra.gmra.mrb[0].mxu1 %vm299_vm1, %v1348_v13  ;;  %v4582_v26 = vpack.c.bf16 %v3295_v23, %v3294_v22  ;;  %v4584_v27 = vpack.c.bf16 %v3297_v25, %v3296_v24  ;;  %v3298_v28 = vld [vmem:[%s4542_s27 + $0x91] sm:$0xff]  ;;  %v3299_v29 = vld [vmem:[%s4542_s27 + $0x99] sm:$0xff]  ;;  %v3300_v30 = vld [vmem:[%s4542_s27 + $0xa9] sm:$0xff] }
  0x17   : > { %3757 = vmatpush3.bf16.msra.mxu1 %v562_v14  ;;  %3861 = vmatmul.mubr.msk.bf16.vlgmr.msra.gmra.mrb[0].mxu0 %vm299_vm1, %v4551_v15  ;;  %v3301_v31 = vld [vmem:[%s4542_s27 + $0xb1] sm:$0xff]  ;;  %v4598_v32 = vpack.c.bf16 %v3299_v29, %v3298_v28  ;;  %v3302_v34 = vld [vmem:[%s4542_s27 + $0xc1] sm:$0xff]  ;;  %v3303_v35 = vld [vmem:[%s4542_s27 + $0xc9] sm:$0xff] }
  0x18   : > { %3893 = vmatpush3.bf16.msra.mxu0 %v1709_v18  ;;  %3728 = vmatprep.mubr.msk.bf16.mxu1 %vm299_vm1, %v4551_v15  ;;  %v4600_v33 = vpack.c.bf16 %v3301_v31, %v3300_v30  ;;  %v3337_v36 = vld [vmem:[%s4542_s27 + $0x1a] sm:$0xff]  ;;  %v3338_v37 = vld [vmem:[%s4542_s27 + $0x22] sm:$0xff]  ;;  %v4614_v38 = vpack.c.bf16 %v3303_v35, %v3302_v34  ;;  %v3339_v42 = vld [vmem:[%s4542_s27 + $0x32] sm:$0xff] }
  0x19   : > { %3864 = vmatprep.mubr.msk.bf16.mxu0 %vm299_vm1, %v4557_v19  ;;  %4293 = vmatprep.subr.msk.bf16.mxu0 %vm348_vm0, %v3418_v20  ;;  %v4616_v39 = vpack.c.bf16 %v3338_v37, %v3337_v36  ;;  %v267_v40 = vld [vmem:[%s4542_s27 + $0xd9] sm:$0xff]  ;;  %v268_v41 = vld [vmem:[%s4542_s27 + $0xe1] sm:$0xff]  ;;  %v269_v44 = vld [vmem:[%s4542_s27 + $0xf1] sm:$0xff] }
  0x1a   : > { %4288 = vmatprep.subr.msk.bf16.mxu1 %vm348_vm0, %v4569_v21  ;;  %v3340_v43 = vld [vmem:[%s4542_s27 + $0x3a] sm:$0xff]  ;;  %v3341_v46 = vld [vmem:[%s4542_s27 + $0x4a] sm:$0xff]  ;;  %v3342_v47 = vld [vmem:[%s4542_s27 + $0x52] sm:$0xff]  ;;  %v4634_v48 = vpack.c.bf16 %v268_v41, %v267_v40 }
  0x1b   : > { %v270_v45 = vld [vmem:[%s4542_s27 + $0xf9] sm:$0xff]  ;;  %v4636_v49 = vpack.c.bf16 %v3340_v43, %v3339_v42  ;;  %v4640_v51 = vpack.c.bf16 %v3342_v47, %v3341_v46  ;;  %v271_v54 = vld [vmem:[%s4542_s27 + $0x109] sm:$0xff]  ;;  %v272_v55 = vld [vmem:[%s4542_s27 + $0x111] sm:$0xff]  ;;  %v824_v47 = vsel %vm348_vm0, %v4569_v21, 0 }
  0x1c   : > { %v4638_v50 = vpack.c.bf16 %v270_v45, %v269_v44  ;;  %v3343_v56 = vld [vmem:[%s4542_s27 + $0x62] sm:$0xff]  ;;  %v3344_v57 = vld [vmem:[%s4542_s27 + $0x6a] sm:$0xff]  ;;  %v3345_v60 = vld [vmem:[%s4542_s27 + $0x7a] sm:$0xff]  ;;  %v4666_v62 = vpack.c.bf16 %v272_v55, %v271_v54 }
  0x1d   : > { %v273_v58 = vld [vmem:[%s4542_s27 + $0x121] sm:$0xff]  ;;  %v274_v59 = vld [vmem:[%s4542_s27 + $0x129] sm:$0xff]  ;;  %v4668_v63 = vpack.c.bf16 %v3344_v57, %v3343_v56  ;;  %v275_v4 = vld [vmem:[%s4542_s27 + $0x139] sm:$0xff] }
  0x1e   : > { %3729 = vmatmul.mubr.msk.bf16.gmra.mrb[4].mxu1 %vm299_vm1, %v4557_v19  ;;  %v3346_v61 = vld [vmem:[%s4542_s27 + $0x82] sm:$0xff]  ;;  %v4670_v0 = vpack.c.bf16 %v274_v59, %v273_v58  ;;  %v3347_v6 = vld [vmem:[%s4542_s27 + $0x92] sm:$0xff]  ;;  %v3348_v7 = vld [vmem:[%s4542_s27 + $0x9a] sm:$0xff] }
  0x1f   : > { %3865 = vmatmul.mubr.msk.bf16.gmra.mrb[4].mxu0 %vm299_vm1, %v4582_v26  ;;  %3732 = vmatprep.mubr.msk.bf16.mxu1 %vm299_vm1, %v4582_v26  ;;  %v4672_v2 = vpack.c.bf16 %v3346_v61, %v3345_v60  ;;  %v276_v5 = vld [vmem:[%s4542_s27 + $0x141] sm:$0xff]  ;;  %v277_v8 = vld [vmem:[%s4542_s27 + $0x151] sm:$0xff]  ;;  %v278_v9 = vld [vmem:[%s4542_s27 + $0x159] sm:$0xff]  ;;  %v4692_v13 = vpack.c.bf16 %v3348_v7, %v3347_v6 }
  0x20   : > { %3868 = vmatprep.mubr.msk.bf16.mxu0 %vm299_vm1, %v4584_v27  ;;  %v3349_v10 = vld [vmem:[%s4542_s27 + $0xaa] sm:$0xff]  ;;  %v3350_v11 = vld [vmem:[%s4542_s27 + $0xb2] sm:$0xff]  ;;  %v4690_v12 = vpack.c.bf16 %v276_v5, %v275_v4  ;;  %v4694_v14 = vpack.c.bf16 %v278_v9, %v277_v8  ;;  %v3351_v20 = vld [vmem:[%s4542_s27 + $0xc2] sm:$0xff] }
  0x21   : > { %v4696_v16 = vpack.c.bf16 %v3350_v11, %v3349_v10  ;;  %v279_v17 = vld [vmem:[%s4542_s27 + $0x169] sm:$0xff]  ;;  %v280_v18 = vld [vmem:[%s4542_s27 + $0x171] sm:$0xff]  ;;  %v200_v23 = vld [vmem:[%s4542_s27] sm:$0xff] }
  0x22   : > { %v3352_v22 = vld [vmem:[%s4542_s27 + $0xca] sm:$0xff]  ;;  %v3353_v25 = vld [vmem:[%s4542_s27 + $0xda] sm:$0xff]  ;;  %v3354_v28 = vld [vmem:[%s4542_s27 + $0xe2] sm:$0xff]  ;;  %v4714_v29 = vpack.c.bf16 %v280_v18, %v279_v17 }
  0x23   : > { %v201_v24 = vld [vmem:[%s4542_s27 + $0x8] sm:$0xff]  ;;  %v4716_v30 = vpack.c.bf16 %v3352_v22, %v3351_v20  ;;  %v4718_v34 = vpack.c.bf16 %v3354_v28, %v3353_v25  ;;  %v202_v35 = vld [vmem:[%s4542_s27 + $0x18] sm:$0xff]  ;;  %v203_v36 = vld [vmem:[%s4542_s27 + $0x20] sm:$0xff] }
  0x24   : > { %v232_v31 = vpack.c.bf16 %v201_v24, %v200_v23  ;;  %v3355_v37 = vld [vmem:[%s4542_s27 + $0xf2] sm:$0xff]  ;;  %v3356_v40 = vld [vmem:[%s4542_s27 + $0xfa] sm:$0xff]  ;;  %v3357_v43 = vld [vmem:[%s4542_s27 + $0x10a] sm:$0xff]  ;;  %v4735_v45 = vpack.c.bf16 %v203_v36, %v202_v35 }
  0x25   : > { %v204_v41 = vld [vmem:[%s4542_s27 + $0x30] sm:$0xff]  ;;  %v205_v42 = vld [vmem:[%s4542_s27 + $0x38] sm:$0xff]  ;;  %v4737_v46 = vpack.c.bf16 %v3356_v40, %v3355_v37  ;;  %v4750_v55 = vld [vmem:[%s5292_s1 + $0x6] sm:$0x3] }
  0x26   : > { %3733 = vmatmul.mubr.msk.bf16.gmra.mrb[8].mxu1 %vm299_vm1, %v4584_v27  ;;  %v3358_v44 = vld [vmem:[%s4542_s27 + $0x112] sm:$0xff]  ;;  %v206_v56 = vld [vmem:[%s4542_s27 + $0x48] sm:$0xff]  ;;  %v208_v59 = vld [vmem:[%s4542_s27 + $0x60] sm:$0xff] }
  0x27   : > { %3869 = vmatmul.mubr.msk.bf16.gmra.mrb[8].mxu0 %vm299_vm1, %v4598_v32  ;;  %3736 = vmatprep.mubr.msk.bf16.mxu1 %vm299_vm1, %v4598_v32  ;;  %v4743_v54 = vpack.c.bf16 %v3358_v44, %v3357_v43  ;;  %v207_v57 = vld [vmem:[%s4542_s27 + $0x50] sm:$0xff]  ;;  %v3359_v21 = vld [vmem:[%s4542_s27 + $0x122] sm:$0xff]  ;;  %v3361_v61 = vld [vmem:[%s4542_s27 + $0x13a] sm:$0xff] }
  0x28   : > { %3872 = vmatprep.mubr.msk.bf16.mxu0 %vm299_vm1, %v4600_v33  ;;  %v3360_v58 = vld [vmem:[%s4542_s27 + $0x12a] sm:$0xff]  ;;  %v3362_v4 = vld [vmem:[%s4542_s27 + $0x142] sm:$0xff]  ;;  %v4768_v5 = vpack.c.bf16 %v207_v57, %v206_v56  ;;  %v210_v9 = vld [vmem:[%s4542_s27 + $0x78] sm:$0xff] }
  0x29   : > { %v209_v60 = vld [vmem:[%s4542_s27 + $0x68] sm:$0xff]  ;;  %v4770_v6 = vpack.c.bf16 %v3360_v58, %v3359_v21  ;;  %v4774_v8 = vpack.c.bf16 %v3362_v4, %v3361_v61  ;;  %v211_v10 = vld [vmem:[%s4542_s27 + $0x80] sm:$0xff]  ;;  %v3363_v11 = vld [vmem:[%s4542_s27 + $0x152] sm:$0xff]  ;;  %v2300_v61 = vsel %vm348_vm0, %v4648_v53, 0 }
  0x2a   : > { %v4772_v7 = vpack.c.bf16 %v209_v60, %v208_v59  ;;  %v3364_v17 = vld [vmem:[%s4542_s27 + $0x15a] sm:$0xff]  ;;  %v212_v18 = vld [vmem:[%s4542_s27 + $0x90] sm:$0xff]  ;;  %v4792_v24 = vpack.c.bf16 %v211_v10, %v210_v9  ;;  %v214_v35 = vld [vmem:[%s4542_s27 + $0xa8] sm:$0xff] }
  0x2b   : > { %v213_v20 = vld [vmem:[%s4542_s27 + $0x98] sm:$0xff]  ;;  %v3365_v22 = vld [vmem:[%s4542_s27 + $0x16a] sm:$0xff]  ;;  %v4794_v25 = vpack.c.bf16 %v3364_v17, %v3363_v11  ;;  %v3367_v37 = vld [vmem:[%s4542_s27 + $0x182] sm:$0xff] }
  0x2c   : > { %v3366_v23 = vld [vmem:[%s4542_s27 + $0x172] sm:$0xff]  ;;  %v4796_v28 = vpack.c.bf16 %v213_v20, %v212_v18  ;;  %v3368_v40 = vld [vmem:[%s4542_s27 + $0x18a] sm:$0xff]  ;;  %v219_v57 = vld [vmem:[%s4542_s27 + $0xe0] sm:$0xff] }
  0x2d   : > { %v215_v36 = vld [vmem:[%s4542_s27 + $0xb0] sm:$0xff]  ;;  %v4816_v44 = vpack.c.bf16 %v3368_v40, %v3367_v37  ;;  %v218_v56 = vld [vmem:[%s4542_s27 + $0xd8] sm:$0xff]  ;;  %v222_v9 = vld [vmem:[%s4542_s27 + $0x108] sm:$0xff] }
  0x2e   : > { %3737 = vmatmul.mubr.msk.bf16.gmra.mrb[12].mxu1 %vm299_vm1, %v4600_v33  ;;  %v4814_v43 = vpack.c.bf16 %v215_v36, %v214_v35  ;;  %v220_v21 = vld [vmem:[%s4542_s27 + $0xf0] sm:$0xff]  ;;  %v221_v58 = vld [vmem:[%s4542_s27 + $0xf8] sm:$0xff]  ;;  %v4832_v59 = vpack.c.bf16 %v219_v57, %v218_v56  ;;  %v225_v11 = vld [vmem:[%s4542_s27 + $0x128] sm:$0xff] }
  0x2f   : > { %3873 = vmatmul.mubr.msk.bf16.gmra.mrb[12].mxu0 %vm299_vm1, %v4614_v38  ;;  %3740 = vmatprep.mubr.msk.bf16.mxu1 %vm299_vm1, %v4614_v38  ;;  %v4834_v60 = vpack.c.bf16 %v221_v58, %v220_v21  ;;  %v3516_v4 = vld [vmem:[%s5292_s1 + $0x10] sm:$0x3]  ;;  %v226_v20 = vld [vmem:[%s4542_s27 + $0x138] sm:$0xff]  ;;  %v230_v40 = vld [vmem:[%s4542_s27 + $0x168] sm:$0xff]  ;;  %v1121_v58 = vsel %vm348_vm0, %v4750_v55, 0 }
  0x30   : > { %3894 = vmatprep.mubr.msk.bf16.mxu0 %vm299_vm1, %v4616_v39  ;;  %v223_v10 = vld [vmem:[%s4542_s27 + $0x110] sm:$0xff]  ;;  %v229_v35 = vld [vmem:[%s4542_s27 + $0x158] sm:$0xff] }
  0x31   : > { %v4854_v17 = vpack.c.bf16 %v223_v10, %v222_v9  ;;  %v726_v56 = vld [vmem:[%s4542_s27 + $0xa] sm:$0xff]  ;;  %v3417_v9 = vld [vmem:[%s4542_s27 + $0x1a0] sm:$0xff] }
  0x36   : > { %3741 = vmatmul.mubr.msk.bf16.gmra.mrb[16].mxu1 %vm299_vm1, %v4634_v48 }
  0x37   : > { %3895 = vmatmul.mubr.msk.bf16.vlgmr.msra.gmra.mrb[0].mxu0 %vm299_vm1, %v4636_v49  ;;  %3744 = vmatprep.mubr.msk.bf16.mxu1 %vm299_vm1, %v4638_v50 }
  0x38   : > { %3927 = vmatpush3.bf16.msra.mxu0 %v2006_v52  ;;  %3898 = vmatprep.mubr.msk.bf16.mxu0 %vm299_vm1, %v4640_v51  ;;  %v4741_v52 = vpack.c.bf16 %v205_v42, %v204_v41  ;;  %v216_v41 = vld [vmem:[%s4542_s27 + $0xc0] sm:$0xff]  ;;  %v217_v42 = vld [vmem:[%s4542_s27 + $0xc8] sm:$0xff] }
  0x39   : > { %4294 = vmatprep.subr.msk.bf16.mxu0 %vm348_vm0, %v4648_v53  ;;  %v224_v53 = vld [vmem:[%s4542_s27 + $0x120] sm:$0xff] }
  0x3a   : > { %v4856_v18 = vpack.c.bf16 %v225_v11, %v224_v53  ;;  %v2594_v53 = vsel %vm348_vm0, %v3516_v4, 0 }
  0x3e   : > { %3745 = vmatmul.mubr.msk.bf16.gmra.mrb[20].mxu1 %vm299_vm1, %v4666_v62 }
  0x3f   : > { %3899 = vmatmul.mubr.msk.bf16.gmra.mrb[4].mxu0 %vm299_vm1, %v4668_v63  ;;  %3748 = vmatprep.mubr.msk.bf16.mxu1 %vm299_vm1, %v4670_v0 }
  0x40   : > { %3902 = vmatprep.mubr.msk.bf16.mxu0 %vm299_vm1, %v4672_v2 }
  0x46   : > { %3749 = vmatmul.mubr.msk.bf16.gmra.mrb[24].mxu1 %vm299_vm1, %v4690_v12 }
  0x47   : > { %3903 = vmatmul.mubr.msk.bf16.gmra.mrb[8].mxu0 %vm299_vm1, %v4692_v13  ;;  %3752 = vmatprep.mubr.msk.bf16.mxu1 %vm299_vm1, %v4694_v14 }
  0x48   : > { %3906 = vmatprep.mubr.msk.bf16.mxu0 %vm299_vm1, %v4696_v16 }
  0x4e   : > { %3753 = vmatmul.mubr.msk.bf16.gmra.mrb[28].mxu1 %vm299_vm1, %v4714_v29 }
  0x4f   : > { %3907 = vmatmul.mubr.msk.bf16.gmra.mrb[12].mxu0 %vm299_vm1, %v4716_v30  ;;  %3758 = vmatprep.mubr.msk.bf16.mxu1 %vm299_vm1, %v232_v31  ;;  %v4798_v31 = vpack.c.bf16 %v3366_v23, %v3365_v22  ;;  %v227_v22 = vld [vmem:[%s4542_s27 + $0x140] sm:$0xff]  ;;  %v228_v23 = vld [vmem:[%s4542_s27 + $0x150] sm:$0xff] }
  0x50   : > { %3910 = vmatprep.mubr.msk.bf16.mxu0 %vm299_vm1, %v4718_v34  ;;  %v4870_v36 = vpack.c.bf16 %v227_v22, %v226_v20  ;;  %v4872_v37 = vpack.c.bf16 %v229_v35, %v228_v23 }
  0x56   : > { %3759 = vmatmul.mubr.msk.bf16.vlgmr.msra.gmra.mrb[0].mxu1 %vm299_vm1, %v4735_v45 }
  0x57   : > { %3791 = vmatpush3.bf16.msra.mxu1 %v824_v47  ;;  %3911 = vmatmul.mubr.msk.bf16.gmra.mrb[16].mxu0 %vm299_vm1, %v4737_v46  ;;  %v4818_v47 = vpack.c.bf16 %v217_v42, %v216_v41  ;;  %v231_v41 = vld [vmem:[%s4542_s27 + $0x170] sm:$0xff]  ;;  %v725_v42 = vld [vmem:[%s4542_s27 + $0x2] sm:$0xff] }
  0x58   : > { %3762 = vmatprep.mubr.msk.bf16.mxu1 %vm299_vm1, %v4741_v52  ;;  %3914 = vmatprep.mubr.msk.bf16.mxu0 %vm299_vm1, %v4743_v54  ;;  %v4886_v57 = vpack.c.bf16 %v231_v41, %v230_v40  ;;  %v757_v21 = vpack.c.bf16 %v726_v56, %v725_v42 }
  0x59   : > { %4289 = vmatprep.subr.msk.bf16.mxu1 %vm348_vm0, %v4750_v55  ;;  %v3415_v55 = vld [vmem:[%s4542_s27 + $0x188] sm:$0xff] }
  0x5e   : > { %3763 = vmatmul.mubr.msk.bf16.gmra.mrb[4].mxu1 %vm299_vm1, %v4768_v5 }
  0x5f   : > { %3915 = vmatmul.mubr.msk.bf16.gmra.mrb[20].mxu0 %vm299_vm1, %v4770_v6  ;;  %3766 = vmatprep.mubr.msk.bf16.mxu1 %vm299_vm1, %v4772_v7 }
  0x60   : > { %3918 = vmatprep.mubr.msk.bf16.mxu0 %vm299_vm1, %v4774_v8 }
  0x66   : > { %3767 = vmatmul.mubr.msk.bf16.gmra.mrb[8].mxu1 %vm299_vm1, %v4792_v24 }
  0x67   : > { %3919 = vmatmul.mubr.msk.bf16.gmra.mrb[24].mxu0 %vm299_vm1, %v4794_v25  ;;  %3770 = vmatprep.mubr.msk.bf16.mxu1 %vm299_vm1, %v4796_v28 }
  0x68   : > { %3922 = vmatprep.mubr.msk.bf16.mxu0 %vm299_vm1, %v4798_v31 }
  0x6e   : > { %3771 = vmatmul.mubr.msk.bf16.gmra.mrb[12].mxu1 %vm299_vm1, %v4814_v43 }
  0x6f   : > { %3923 = vmatmul.mubr.msk.bf16.gmra.mrb[28].mxu0 %vm299_vm1, %v4816_v44  ;;  %3774 = vmatprep.mubr.msk.bf16.mxu1 %vm299_vm1, %v4818_v47 }
  0x70   : > { %3928 = vmatprep.mubr.msk.bf16.mxu0 %vm299_vm1, %v4741_v52 }
  0x76   : > { %3775 = vmatmul.mubr.msk.bf16.gmra.mrb[16].mxu1 %vm299_vm1, %v4832_v59 }
  0x77   : > { %3929 = vmatmul.mubr.msk.bf16.vlgmr.msra.gmra.mrb[0].mxu0 %vm299_vm1, %v4768_v5  ;;  %3778 = vmatprep.mubr.msk.bf16.mxu1 %vm299_vm1, %v4834_v60 }
  0x78   : > { %3961 = vmatpush3.bf16.msra.mxu0 %v2300_v61  ;;  %3932 = vmatprep.mubr.msk.bf16.mxu0 %vm299_vm1, %v4772_v7 }
  0x79   : > { %4295 = vmatprep.subr.msk.bf16.mxu0 %vm348_vm0, %v3516_v4 }
  0x7e   : > { %3779 = vmatmul.mubr.msk.bf16.gmra.mrb[20].mxu1 %vm299_vm1, %v4854_v17 }
  0x7f   : > { %3933 = vmatmul.mubr.msk.bf16.gmra.mrb[4].mxu0 %vm299_vm1, %v4792_v24  ;;  %3782 = vmatprep.mubr.msk.bf16.mxu1 %vm299_vm1, %v4856_v18 }
  0x80   : > { %3936 = vmatprep.mubr.msk.bf16.mxu0 %vm299_vm1, %v4796_v28 }
  0x86   : > { %3783 = vmatmul.mubr.msk.bf16.gmra.mrb[24].mxu1 %vm299_vm1, %v4870_v36 }
  0x87   : > { %3937 = vmatmul.mubr.msk.bf16.gmra.mrb[8].mxu0 %vm299_vm1, %v4814_v43  ;;  %3786 = vmatprep.mubr.msk.bf16.mxu1 %vm299_vm1, %v4872_v37 }
  0x88   : > { %3940 = vmatprep.mubr.msk.bf16.mxu0 %vm299_vm1, %v4818_v47 }
  0x8e   : > { %3787 = vmatmul.mubr.msk.bf16.gmra.mrb[28].mxu1 %vm299_vm1, %v4886_v57 }
  0x8f   : > { %3941 = vmatmul.mubr.msk.bf16.gmra.mrb[12].mxu0 %vm299_vm1, %v4832_v59  ;;  %3792 = vmatprep.mubr.msk.bf16.mxu1 %vm299_vm1, %v757_v21 }
  0x90   : > { %3944 = vmatprep.mubr.msk.bf16.mxu0 %vm299_vm1, %v4834_v60 }
  0x96   : > { %3793 = vmatmul.mubr.msk.bf16.vlgmr.msra.gmra.mrb[0].mxu1 %vm299_vm1, %v4616_v39  ;;  %v3414_v39 = vld [vmem:[%s4542_s27 + $0x180] sm:$0xff] }
  0x97   : > { %3825 = vmatpush3.bf16.msra.mxu1 %v1121_v58  ;;  %3945 = vmatmul.mubr.msk.bf16.gmra.mrb[16].mxu0 %vm299_vm1, %v4854_v17  ;;  %v4917_v61 = vpack.c.bf16 %v3415_v55, %v3414_v39 }
  0x98   : > { %3796 = vmatprep.mubr.msk.bf16.mxu1 %vm299_vm1, %v4636_v49  ;;  %3948 = vmatprep.mubr.msk.bf16.mxu0 %vm299_vm1, %v4856_v18 }
  0x99   : > { %4291 = vmatprep.subr.msk.bf16.mxu1 %vm348_vm0, %v4517_v1  ;;  %v3416_v1 = vld [vmem:[%s4542_s27 + $0x198] sm:$0xff] }
  0x9a   : > { %v1954_v10 = vpack.c.bf16 %v3417_v9, %v3416_v1 }
  0x9e   : > { %3797 = vmatmul.mubr.msk.bf16.gmra.mrb[4].mxu1 %vm299_vm1, %v4640_v51 }
  0x9f   : > { %3949 = vmatmul.mubr.msk.bf16.gmra.mrb[20].mxu0 %vm299_vm1, %v4870_v36  ;;  %3800 = vmatprep.mubr.msk.bf16.mxu1 %vm299_vm1, %v4668_v63 }
  0xa0   : > { %3952 = vmatprep.mubr.msk.bf16.mxu0 %vm299_vm1, %v4872_v37 }
  0xa6   : > { %3801 = vmatmul.mubr.msk.bf16.gmra.mrb[8].mxu1 %vm299_vm1, %v4672_v2 }
  0xa7   : > { %3953 = vmatmul.mubr.msk.bf16.gmra.mrb[24].mxu0 %vm299_vm1, %v4886_v57  ;;  %3804 = vmatprep.mubr.msk.bf16.mxu1 %vm299_vm1, %v4692_v13 }
  0xa8   : > { %3956 = vmatprep.mubr.msk.bf16.mxu0 %vm299_vm1, %v4917_v61 }
  0xae   : > { %3805 = vmatmul.mubr.msk.bf16.gmra.mrb[12].mxu1 %vm299_vm1, %v4696_v16 }
  0xaf   : > { %3957 = vmatmul.mubr.msk.bf16.gmra.mrb[28].mxu0 %vm299_vm1, %v1954_v10  ;;  %3808 = vmatprep.mubr.msk.bf16.mxu1 %vm299_vm1, %v4716_v30 }
  0xb0   : > { %3962 = vmatprep.mubr.msk.bf16.mxu0 %vm299_vm1, %v4551_v15  ;;  %v3464_v15 = vld [vmem:[%s4542_s27 + $0x189] sm:$0xff] }
  0xb6   : > { %3809 = vmatmul.mubr.msk.bf16.gmra.mrb[16].mxu1 %vm299_vm1, %v4718_v34 }
  0xb7   : > { %3963 = vmatmul.mubr.msk.bf16.vlgmr.msra.gmra.mrb[0].mxu0 %vm299_vm1, %v4557_v19  ;;  %3812 = vmatprep.mubr.msk.bf16.mxu1 %vm299_vm1, %v4737_v46 }
  0xb8   : > { %3995 = vmatpush3.bf16.msra.mxu0 %v2594_v53  ;;  %3966 = vmatprep.mubr.msk.bf16.mxu0 %vm299_vm1, %v4582_v26  ;;  %v3465_v26 = vld [vmem:[%s4542_s27 + $0x199] sm:$0xff] }
  0xbe   : > { %3813 = vmatmul.mubr.msk.bf16.gmra.mrb[20].mxu1 %vm299_vm1, %v4743_v54 }
  0xbf   : > { %3967 = vmatmul.mubr.msk.bf16.gmra.mrb[4].mxu0 %vm299_vm1, %v4584_v27  ;;  %3816 = vmatprep.mubr.msk.bf16.mxu1 %vm299_vm1, %v4770_v6  ;;  %v3466_v27 = vld [vmem:[%s4542_s27 + $0x1a1] sm:$0xff] }
  0xc0   : > { %3970 = vmatprep.mubr.msk.bf16.mxu0 %vm299_vm1, %v4598_v32  ;;  %v2248_v32 = vpack.c.bf16 %v3466_v27, %v3465_v26 }
  0xc6   : > { %3817 = vmatmul.mubr.msk.bf16.gmra.mrb[24].mxu1 %vm299_vm1, %v4774_v8 }
  0xc7   : > { %3971 = vmatmul.mubr.msk.bf16.gmra.mrb[8].mxu0 %vm299_vm1, %v4600_v33  ;;  %3820 = vmatprep.mubr.msk.bf16.mxu1 %vm299_vm1, %v4794_v25  ;;  %v3514_v33 = vld [vmem:[%s4542_s27 + $0x19a] sm:$0xff] }
  0xc8   : > { %3974 = vmatprep.mubr.msk.bf16.mxu0 %vm299_vm1, %v4614_v38  ;;  %v3515_v38 = vld [vmem:[%s4542_s27 + $0x1a2] sm:$0xff] }
  0xce   : > { %3821 = vmatmul.mubr.msk.bf16.gmra.mrb[28].mxu1 %vm299_vm1, %v4798_v31 }
  0xcf   : > { %3975 = vmatmul.mubr.msk.bf16.gmra.mrb[12].mxu0 %vm299_vm1, %v4634_v48  ;;  %3826 = vmatprep.mubr.msk.bf16.mxu1 %vm299_vm1, %v4735_v45 }
  0xd0   : > { %3978 = vmatprep.mubr.msk.bf16.mxu0 %vm299_vm1, %v4638_v50 }
  0xd6   : > { %3827 = vmatmul.mubr.msk.bf16.vlgmr.msra.gmra.mrb[0].mxu1 %vm299_vm1, %v4741_v52 }
  0xd7   : > { %4029 = vmatpush3.bf16.msra.mxu1 %v4525_v3  ;;  %3979 = vmatmul.mubr.msk.bf16.gmra.mrb[16].mxu0 %vm299_vm1, %v4666_v62  ;;  %v3463_v3 = vld [vmem:[%s4542_s27 + $0x181] sm:$0xff] }
  0xd8   : > { %3830 = vmatprep.mubr.msk.bf16.mxu1 %vm299_vm1, %v4768_v5  ;;  %3982 = vmatprep.mubr.msk.bf16.mxu0 %vm299_vm1, %v4670_v0  ;;  %v2247_v19 = vpack.c.bf16 %v3464_v15, %v3463_v3 }
  0xde   : > { %3831 = vmatmul.mubr.msk.bf16.gmra.mrb[4].mxu1 %vm299_vm1, %v4772_v7 }
  0xdf   : > { %3983 = vmatmul.mubr.msk.bf16.gmra.mrb[20].mxu0 %vm299_vm1, %v4690_v12  ;;  %3834 = vmatprep.mubr.msk.bf16.mxu1 %vm299_vm1, %v4792_v24 }
  0xe0   : > { %3986 = vmatprep.mubr.msk.bf16.mxu0 %vm299_vm1, %v4694_v14 }
  0xe6   : > { %3835 = vmatmul.mubr.msk.bf16.gmra.mrb[8].mxu1 %vm299_vm1, %v4796_v28 }
  0xe7   : > { %3987 = vmatmul.mubr.msk.bf16.gmra.mrb[24].mxu0 %vm299_vm1, %v4714_v29  ;;  %3838 = vmatprep.mubr.msk.bf16.mxu1 %vm299_vm1, %v4814_v43 }
  0xe8   : > { %3990 = vmatprep.mubr.msk.bf16.mxu0 %vm299_vm1, %v2247_v19 }
  0xee   : > { %3839 = vmatmul.mubr.msk.bf16.gmra.mrb[12].mxu1 %vm299_vm1, %v4818_v47 }
  0xef   : > { %3991 = vmatmul.mubr.msk.bf16.gmra.mrb[28].mxu0 %vm299_vm1, %v2248_v32  ;;  %3842 = vmatprep.mubr.msk.bf16.mxu1 %vm299_vm1, %v4832_v59 }
  0xf0   : > { %3996 = vmatprep.mubr.msk.bf16.mxu0 %vm299_vm1, %v4636_v49 }
  0xf6   : > { %3843 = vmatmul.mubr.msk.bf16.gmra.mrb[16].mxu1 %vm299_vm1, %v4834_v60 }
  0xf7   : > { %3997 = vmatmul.mubr.msk.bf16.vlgmr.msra.gmra.mrb[0].mxu0 %vm299_vm1, %v4640_v51  ;;  %3846 = vmatprep.mubr.msk.bf16.mxu1 %vm299_vm1, %v4854_v17 }
  0xf8   : > { %4000 = vmatprep.mubr.msk.bf16.mxu0 %vm299_vm1, %v4668_v63 }
  0xfe   : > { %3847 = vmatmul.mubr.msk.bf16.gmra.mrb[20].mxu1 %vm299_vm1, %v4856_v18 }
  0xff   : > { %4001 = vmatmul.mubr.msk.bf16.gmra.mrb[4].mxu0 %vm299_vm1, %v4672_v2  ;;  %3850 = vmatprep.mubr.msk.bf16.mxu1 %vm299_vm1, %v4870_v36 }
 0x100   : > { %4004 = vmatprep.mubr.msk.bf16.mxu0 %vm299_vm1, %v4692_v13 }
 0x106   : > { %3851 = vmatmul.mubr.msk.bf16.gmra.mrb[24].mxu1 %vm299_vm1, %v4872_v37 }
 0x107   : > { %4005 = vmatmul.mubr.msk.bf16.gmra.mrb[8].mxu0 %vm299_vm1, %v4696_v16  ;;  %3854 = vmatprep.mubr.msk.bf16.mxu1 %vm299_vm1, %v4886_v57 }
 0x108   : > { %4008 = vmatprep.mubr.msk.bf16.mxu0 %vm299_vm1, %v4716_v30 }
 0x10e   : > { %3855 = vmatmul.mubr.msk.bf16.gmra.mrb[28].mxu1 %vm299_vm1, %v4917_v61 }
 0x10f   : > { %4009 = vmatmul.mubr.msk.bf16.gmra.mrb[12].mxu0 %vm299_vm1, %v4718_v34  ;;  %3876 = vmatprep.mubr.msk.bf16.mxu1 %vm299_vm1, %v4634_v48  ;;  %v2542_v48 = vpack.c.bf16 %v3515_v38, %v3514_v33 }
 0x110   : > { %4012 = vmatprep.mubr.msk.bf16.mxu0 %vm299_vm1, %v4737_v46 }
 0x116   : > { %3877 = vmatmul.mubr.msk.bf16.vlgmr.msra.gmra.mrb[16].mxu1 %vm299_vm1, %v4638_v50 }
 0x117   : > { %4013 = vmatmul.mubr.msk.bf16.gmra.mrb[16].mxu0 %vm299_vm1, %v4743_v54  ;;  %3880 = vmatprep.mubr.msk.bf16.mxu1 %vm299_vm1, %v4666_v62  ;;  %v5077_v54 = vld [vmem:[%s5293_s2] ss:$0 sm:$0xff] }
 0x118   : > { %4016 = vmatprep.mubr.msk.bf16.mxu0 %vm299_vm1, %v4770_v6 }
 0x11e   : > { %3881 = vmatmul.mubr.msk.bf16.gmra.mrb[20].mxu1 %vm299_vm1, %v4670_v0 }
 0x11f   : > { %4017 = vmatmul.mubr.msk.bf16.gmra.mrb[20].mxu0 %vm299_vm1, %v4774_v8  ;;  %3884 = vmatprep.mubr.msk.bf16.mxu1 %vm299_vm1, %v4690_v12 }
 0x120   : > { %4020 = vmatprep.mubr.msk.bf16.mxu0 %vm299_vm1, %v4794_v25 }
 0x126   : > { %3885 = vmatmul.mubr.msk.bf16.gmra.mrb[24].mxu1 %vm299_vm1, %v4694_v14 }
 0x127   : > { %4021 = vmatmul.mubr.msk.bf16.gmra.mrb[24].mxu0 %vm299_vm1, %v4798_v31  ;;  %3888 = vmatprep.mubr.msk.bf16.mxu1 %vm299_vm1, %v4714_v29 }
 0x128   : > { %4024 = vmatprep.mubr.msk.bf16.mxu0 %vm299_vm1, %v4816_v44 }
 0x12e   : > { %3889 = vmatmul.mubr.msk.bf16.gmra.mrb[28].mxu1 %vm299_vm1, %v2247_v19 }
 0x12f   : > { %4025 = vmatmul.mubr.msk.bf16.gmra.mrb[28].mxu0 %vm299_vm1, %v2542_v48 }
 0x1a9   : > { %v3828_v49 = vpop.f32.mrb[0].mxu1 }
 0x1aa   : > { %v1157_v50 = vpop.f32.mrb[1].mxu1 }
 0x1ab   : > { %v3829_v51 = vpop.f32.mrb[2].mxu1 }
 0x1ac   : > { %v1160_v62 = vpop.f32.mrb[3].mxu1 }
 0x1b1   : > { %v3832_v63 = vpop.f32.mrb[4].mxu1 }
 0x1b2   : > { %v1173_v0 = vpop.f32.mrb[5].mxu1 }
 0x1b3   : > { %v3833_v2 = vpop.f32.mrb[6].mxu1 }
 0x1b4   : > { %v1176_v12 = vpop.f32.mrb[7].mxu1 }
 0x1b9   : > { %v3836_v13 = vpop.f32.mrb[8].mxu1 }
 0x1ba   : > { %v1189_v14 = vpop.f32.mrb[9].mxu1 }
 0x1bb   : > { %v3837_v16 = vpop.f32.mrb[10].mxu1 }
 0x1bc   : > { %v5064_v29 = vpop.f32.mrb[11].mxu1 }
 0x1c1   : > { %v5066_v30 = vpop.f32.mrb[12].mxu1 }
 0x1c2   : > { %v5068_v34 = vpop.f32.mrb[13].mxu1 }
 0x1c3   : > { %v5070_v45 = vpop.f32.mrb[14].mxu1 }
 0x1c4   : > { %v5072_v46 = vpop.f32.mrb[15].mxu1 }
 0x1ca   : > { %v3998_v52 = vpop.f32.mrb[0].mxu0 }
 0x1cb   : > { %v4030_v5 = vadd.f32 %v3998_v52, %v3828_v49  ;;  %v2630_v6 = vpop.f32.mrb[1].mxu0 }
 0x1cc   : > { %v4031_v7 = vadd.f32 %v2630_v6, %v1157_v50  ;;  %v3999_v8 = vpop.f32.mrb[2].mxu0 }
 0x1cd   : > { %v5080_v24 = vadd.f32 %v4030_v5, %v5077_v54  ;;  %v4032_v25 = vadd.f32 %v3999_v8, %v3829_v51  ;;  %v2633_v28 = vpop.f32.mrb[3].mxu0 }
 0x1ce   : > { %v5083_v31 = vadd.f32 %v4031_v7, %v5077_v54  ;;  %v4033_v43 = vadd.f32 %v2633_v28, %v1160_v62 }
 0x1cf   : > { %v3536_v44 = vmul.f32 -1.442695, %v5080_v24  ;;  %v5087_v47 = vadd.f32 %v4032_v25, %v5077_v54 }
 0x1d0   : > { %v3534_v59 = vmul.f32 -1.442695, %v5083_v31  ;;  %v5091_v60 = vadd.f32 %v4033_v43, %v5077_v54 }
 0x1d1   : > { %4321 = vpow2.f32 %v3536_v44  ;;  %v3537_v4 = vmul.f32 -1.442695, %v5087_v47 }
 0x1d2   : > { %4323 = vpow2.f32 %v3534_v59  ;;  %v3535_v11 = vmul.f32 -1.442695, %v5091_v60  ;;  %v4002_v17 = vpop.f32.mrb[4].mxu0 }
 0x1d3   : > { %4325 = vpow2.f32 %v3537_v4  ;;  %v4034_v18 = vadd.f32 %v4002_v17, %v3832_v63  ;;  %v2646_v20 = vpop.f32.mrb[5].mxu0 }
 0x1d4   : > { %4327 = vpow2.f32 %v3535_v11  ;;  %v4035_v22 = vadd.f32 %v2646_v20, %v1173_v0  ;;  %v4003_v23 = vpop.f32.mrb[6].mxu0 }
 0x1d5   : > { %v5096_v35 = vadd.f32 %v4034_v18, %v5077_v54  ;;  %v4036_v36 = vadd.f32 %v4003_v23, %v3833_v2  ;;  %v2649_v37 = vpop.f32.mrb[7].mxu0 }
 0x1d6   : > { %v5099_v40 = vadd.f32 %v4035_v22, %v5077_v54  ;;  %v4037_v41 = vadd.f32 %v2649_v37, %v1176_v12 }
 0x1d7   : > { %v3540_v42 = vmul.f32 -1.442695, %v5096_v35  ;;  %v5103_v56 = vadd.f32 %v4036_v36, %v5077_v54 }
 0x1d8   : > { %v3538_v57 = vmul.f32 -1.442695, %v5099_v40  ;;  %v5107_v21 = vadd.f32 %v4037_v41, %v5077_v54 }
 0x1d9   : > { %4329 = vpow2.f32 %v3540_v42  ;;  %v3541_v58 = vmul.f32 -1.442695, %v5103_v56 }
 0x1da   : > { %4331 = vpow2.f32 %v3538_v57  ;;  %v3539_v39 = vmul.f32 -1.442695, %v5107_v21  ;;  %v4006_v55 = vpop.f32.mrb[8].mxu0 }
 0x1db   : > { %v4322_v61 = vpop.eup %4321  ;;  %4333 = vpow2.f32 %v3541_v58  ;;  %v4038_v1 = vadd.f32 %v4006_v55, %v3836_v13  ;;  %v2662_v9 = vpop.f32.mrb[9].mxu0 }
 0x1dc   : > { %v4324_v10 = vpop.eup %4323  ;;  %v2926_v53 = vadd.f32 1.0, %v4322_v61  ;;  %4335 = vpow2.f32 %v3539_v39  ;;  %v4039_v3 = vadd.f32 %v2662_v9, %v1189_v14  ;;  %v4007_v15 = vpop.f32.mrb[10].mxu0 }
 0x1dd   : > { %v4326_v19 = vpop.eup %4325  ;;  %v2924_v26 = vadd.f32 1.0, %v4324_v10  ;;  %v5112_v27 = vadd.f32 %v4038_v1, %v5077_v54  ;;  %v4040_v32 = vadd.f32 %v4007_v15, %v3837_v16  ;;  %v2665_v33 = vpop.f32.mrb[11].mxu0 }
 0x1de   : > { %v4328_v38 = vpop.eup %4327  ;;  %4337 = vrcp.f32 %v2926_v53  ;;  %v2927_v48 = vadd.f32 1.0, %v4326_v19  ;;  %v5115_v49 = vadd.f32 %v4039_v3, %v5077_v54  ;;  %v4041_v50 = vadd.f32 %v2665_v33, %v5064_v29 }
 0x1df   : > { %4339 = vrcp.f32 %v2924_v26  ;;  %v2925_v51 = vadd.f32 1.0, %v4328_v38  ;;  %v3544_v62 = vmul.f32 -1.442695, %v5112_v27  ;;  %v5120_v63 = vadd.f32 %v4040_v32, %v5077_v54 }
 0x1e0   : > { %4341 = vrcp.f32 %v2927_v48  ;;  %v3542_v0 = vmul.f32 -1.442695, %v5115_v49  ;;  %v5124_v2 = vadd.f32 %v4041_v50, %v5077_v54 }
 0x1e1   : > { %4343 = vrcp.f32 %v2925_v51  ;;  %v3545_v12 = vmul.f32 -1.442695, %v5120_v63 }
 0x1e2   : > { %4345 = vpow2.f32 %v3544_v62  ;;  %v3543_v13 = vmul.f32 -1.442695, %v5124_v2  ;;  %v4010_v14 = vpop.f32.mrb[12].mxu0 }
 0x1e3   : > { %v4330_v16 = vpop.eup %4329  ;;  %4347 = vpow2.f32 %v3542_v0  ;;  %v4042_v29 = vadd.f32 %v4010_v14, %v5066_v30  ;;  %v2678_v52 = vpop.f32.mrb[13].mxu0 }
 0x1e4   : > { %v4332_v5 = vpop.eup %4331  ;;  %v2930_v6 = vadd.f32 1.0, %v4330_v16  ;;  %4349 = vpow2.f32 %v3545_v12  ;;  %v4043_v7 = vadd.f32 %v2678_v52, %v5068_v34  ;;  %v4011_v8 = vpop.f32.mrb[14].mxu0 }
 0x1e5   : > { %v4334_v25 = vpop.eup %4333  ;;  %v2928_v28 = vadd.f32 1.0, %v4332_v5  ;;  %4351 = vpow2.f32 %v3543_v13  ;;  %v5132_v43 = vadd.f32 %v4042_v29, %v5077_v54  ;;  %v4044_v44 = vadd.f32 %v4011_v8, %v5070_v45  ;;  %v2681_v59 = vpop.f32.mrb[15].mxu0 }
 0x1e6   : > { %v4336_v4 = vpop.eup %4335  ;;  %4353 = vrcp.f32 %v2930_v6  ;;  %v2931_v30 = vadd.f32 1.0, %v4334_v25  ;;  %v5136_v11 = vadd.f32 %v4043_v7, %v5077_v54  ;;  %v4045_v17 = vadd.f32 %v2681_v59, %v5072_v46 }
 0x1e7   : > { %4355 = vrcp.f32 %v2928_v28  ;;  %v2929_v34 = vadd.f32 1.0, %v4336_v4  ;;  %v3548_v18 = vmul.f32 -1.442695, %v5132_v43  ;;  %v5141_v20 = vadd.f32 %v4044_v44, %v5077_v54 }
 0x1e8   : > { %v4338_v22 = vpop.eup %4337  ;;  %4357 = vrcp.f32 %v2931_v30  ;;  %v3546_v45 = vmul.f32 -1.442695, %v5136_v11  ;;  %v5150_v23 = vadd.f32 %v4045_v17, %v5077_v54 }
 0x1e9   : > { %v4340_v46 = vpop.eup %4339  ;;  %v3022_v36 = vmul.f32 %v4338_v22, %v5080_v24  ;;  %4359 = vrcp.f32 %v2929_v34  ;;  %v3549_v37 = vmul.f32 -1.442695, %v5141_v20  ;;  %v3878_v41 = vpop.f32.mrb[16].mxu1 }
 0x1ea   : > { %v4342_v42 = vpop.eup %4341  ;;  %v3020_v57 = vmul.f32 %v4340_v46, %v5083_v31  ;;  %4361 = vpow2.f32 %v3548_v18  ;;  %v3547_v58 = vmul.f32 -1.442695, %v5150_v23  ;;  %v4014_v39 = vpop.f32.mrb[16].mxu0 }
 0x1eb   : > { %v1515_v55 = vpop.f32.mrb[17].mxu1  ;;  %v4344_v61 = vpop.eup %4343  ;;  %3054 = vst [vmem:[%s5146_s19 + $0x10] sm:$0xff] %v3022_v36  ;;  %v3023_v1 = vmul.f32 %v4342_v42, %v5087_v47  ;;  %4363 = vpow2.f32 %v3546_v45  ;;  %v4046_v24 = vadd.f32 %v4014_v39, %v3878_v41 }
 0x1ec   : > { %v2694_v9 = vpop.f32.mrb[17].mxu0  ;;  %v3879_v10 = vpop.f32.mrb[18].mxu1  ;;  %3052 = vst [vmem:[%s5146_s19] sm:$0xff] %v3020_v57  ;;  %v3021_v3 = vmul.f32 %v4344_v61, %v5091_v60  ;;  %4365 = vpow2.f32 %v3549_v37 }
 0x1ed   : > { %v4346_v53 = vpop.eup %4345  ;;  %v4047_v31 = vadd.f32 %v2694_v9, %v1515_v55  ;;  %v4015_v15 = vpop.f32.mrb[18].mxu0  ;;  %3055 = vst [vmem:[%s5146_s19 + $0x18] sm:$0xff] %v3023_v1  ;;  %4367 = vpow2.f32 %v3547_v58  ;;  %v5162_v33 = vadd.f32 %v4046_v24, %v5077_v54 }
 0x1ee   : > { %v1518_v19 = vpop.f32.mrb[19].mxu1  ;;  %v4348_v26 = vpop.eup %4347  ;;  %v2934_v32 = vadd.f32 1.0, %v4346_v53  ;;  %v4048_v47 = vadd.f32 %v4015_v15, %v3879_v10  ;;  %3053 = vst [vmem:[%s5146_s19 + $0x8] sm:$0xff] %v3021_v3 }
 0x1ef   : > { %v2697_v38 = vpop.f32.mrb[19].mxu0  ;;  %v4350_v48 = vpop.eup %4349  ;;  %v2932_v50 = vadd.f32 1.0, %v4348_v26  ;;  %v5166_v51 = vadd.f32 %v4047_v31, %v5077_v54  ;;  %v3552_v12 = vmul.f32 -1.442695, %v5162_v33 }
 0x1f0   : > { %v4049_v60 = vadd.f32 %v2697_v38, %v1518_v19  ;;  %v4352_v62 = vpop.eup %4351  ;;  %4369 = vrcp.f32 %v2934_v32  ;;  %v2935_v0 = vadd.f32 1.0, %v4350_v48  ;;  %v5170_v13 = vadd.f32 %v4048_v47, %v5077_v54 }
 0x1f1   : > { %v4354_v14 = vpop.eup %4353  ;;  %4371 = vrcp.f32 %v2932_v50  ;;  %v2933_v16 = vadd.f32 1.0, %v4352_v62  ;;  %v3550_v29 = vmul.f32 -1.442695, %v5166_v51  ;;  %v3882_v8 = vpop.f32.mrb[20].mxu1 }
 0x1f2   : > { %v5174_v52 = vadd.f32 %v4049_v60, %v5077_v54  ;;  %v4356_v5 = vpop.eup %4355  ;;  %v3026_v6 = vmul.f32 %v4354_v14, %v5096_v35  ;;  %4373 = vrcp.f32 %v2935_v0  ;;  %v3553_v7 = vmul.f32 -1.442695, %v5170_v13  ;;  %v4018_v59 = vpop.f32.mrb[20].mxu0 }
 0x1f3   : > { %v4358_v25 = vpop.eup %4357  ;;  %v3024_v28 = vmul.f32 %v4356_v5, %v5099_v40  ;;  %4375 = vrcp.f32 %v2933_v16  ;;  %v1531_v4 = vpop.f32.mrb[21].mxu1  ;;  %v4050_v35 = vadd.f32 %v4018_v59, %v3882_v8 }
 0x1f4   : > { %v3551_v44 = vmul.f32 -1.442695, %v5174_v52  ;;  %v4360_v30 = vpop.eup %4359  ;;  %3058 = vst [vmem:[%s5146_s19 + $0x30] sm:$0xff] %v3026_v6  ;;  %v3027_v17 = vmul.f32 %v4358_v25, %v5103_v56  ;;  %4377 = vpow2.f32 %v3552_v12  ;;  %v2710_v34 = vpop.f32.mrb[21].mxu0 }
 0x1f5   : > { %v3883_v18 = vpop.f32.mrb[22].mxu1  ;;  %v4362_v22 = vpop.eup %4361  ;;  %3056 = vst [vmem:[%s5146_s19 + $0x20] sm:$0xff] %v3024_v28  ;;  %v3025_v45 = vmul.f32 %v4360_v30, %v5107_v21  ;;  %4379 = vpow2.f32 %v3550_v29  ;;  %v4051_v40 = vadd.f32 %v2710_v34, %v1531_v4  ;;  %v5186_v42 = vadd.f32 %v4050_v35, %v5077_v54 }
 0x1f6   : > { %v4019_v46 = vpop.f32.mrb[22].mxu0  ;;  %v1534_v36 = vpop.f32.mrb[23].mxu1  ;;  %3059 = vst [vmem:[%s5146_s19 + $0x38] sm:$0xff] %v3027_v17  ;;  %v2938_v41 = vadd.f32 1.0, %v4362_v22  ;;  %4381 = vpow2.f32 %v3553_v7 }
 0x1f7   : > { %v4364_v37 = vpop.eup %4363  ;;  %v4052_v56 = vadd.f32 %v4019_v46, %v3883_v18  ;;  %v2713_v57 = vpop.f32.mrb[23].mxu0  ;;  %3057 = vst [vmem:[%s5146_s19 + $0x28] sm:$0xff] %v3025_v45  ;;  %4383 = vpow2.f32 %v3551_v44  ;;  %v5190_v55 = vadd.f32 %v4051_v40, %v5077_v54  ;;  %v3556_v24 = vmul.f32 -1.442695, %v5186_v42 }
 0x1f8   : > { %v4366_v58 = vpop.eup %4365  ;;  %v2936_v39 = vadd.f32 1.0, %v4364_v37  ;;  %v4053_v21 = vadd.f32 %v2713_v57, %v1534_v36  ;;  %4385 = vrcp.f32 %v2938_v41 }
 0x1f9   : > { %v4368_v61 = vpop.eup %4367  ;;  %v2939_v1 = vadd.f32 1.0, %v4366_v58  ;;  %v5194_v9 = vadd.f32 %v4052_v56, %v5077_v54  ;;  %v3554_v53 = vmul.f32 -1.442695, %v5190_v55  ;;  %v3886_v19 = vpop.f32.mrb[24].mxu1 }
 0x1fa   : > { %4387 = vrcp.f32 %v2936_v39  ;;  %v2937_v10 = vadd.f32 1.0, %v4368_v61  ;;  %v5198_v3 = vadd.f32 %v4053_v21, %v5077_v54  ;;  %v4370_v31 = vpop.eup %4369  ;;  %v4022_v38 = vpop.f32.mrb[24].mxu0 }
 0x1fb   : > { %4389 = vrcp.f32 %v2939_v1  ;;  %v3557_v15 = vmul.f32 -1.442695, %v5194_v9  ;;  %v4372_v26 = vpop.eup %4371  ;;  %v3030_v32 = vmul.f32 %v4370_v31, %v5112_v27  ;;  %v1547_v48 = vpop.f32.mrb[25].mxu1  ;;  %v4054_v62 = vadd.f32 %v4022_v38, %v3886_v19 }
 0x1fc   : > { %4391 = vrcp.f32 %v2937_v10  ;;  %v3555_v47 = vmul.f32 -1.442695, %v5198_v3  ;;  %v4374_v50 = vpop.eup %4373  ;;  %v3028_v60 = vmul.f32 %v4372_v26, %v5115_v49  ;;  %v2726_v0 = vpop.f32.mrb[25].mxu0 }
 0x1fd   : > { %4393 = vpow2.f32 %v3556_v24  ;;  %v3887_v12 = vpop.f32.mrb[26].mxu1  ;;  %v4376_v14 = vpop.eup %4375  ;;  %3062 = vst [vmem:[%s5146_s19 + $0x50] sm:$0xff] %v3030_v32  ;;  %v3031_v16 = vmul.f32 %v4374_v50, %v5120_v63  ;;  %v4055_v27 = vadd.f32 %v2726_v0, %v1547_v48  ;;  %v5209_v49 = vadd.f32 %v4054_v62, %v5077_v54 }
 0x1fe   : > { %4395 = vpow2.f32 %v3554_v53  ;;  %v4023_v29 = vpop.f32.mrb[26].mxu0  ;;  %v1550_v5 = vpop.f32.mrb[27].mxu1  ;;  %3060 = vst [vmem:[%s5146_s19 + $0x40] sm:$0xff] %v3028_v60  ;;  %v3029_v7 = vmul.f32 %v4376_v14, %v5124_v2 }
 0x1ff   : > { %v4378_v6 = vpop.eup %4377  ;;  %4397 = vpow2.f32 %v3557_v15  ;;  %v4056_v8 = vadd.f32 %v4023_v29, %v3887_v12  ;;  %v2729_v25 = vpop.f32.mrb[27].mxu0  ;;  %3063 = vst [vmem:[%s5146_s19 + $0x58] sm:$0xff] %v3031_v16  ;;  %v5213_v63 = vadd.f32 %v4055_v27, %v5077_v54  ;;  %v3560_v34 = vmul.f32 -1.442695, %v5209_v49 }
 0x200   : > { %v4380_v28 = vpop.eup %4379  ;;  %v2942_v44 = vadd.f32 1.0, %v4378_v6  ;;  %4399 = vpow2.f32 %v3555_v47  ;;  %v4057_v59 = vadd.f32 %v2729_v25, %v1550_v5  ;;  %3061 = vst [vmem:[%s5146_s19 + $0x48] sm:$0xff] %v3029_v7 }
 0x201   : > { %v4382_v4 = vpop.eup %4381  ;;  %v2940_v30 = vadd.f32 1.0, %v4380_v28  ;;  %v5217_v17 = vadd.f32 %v4056_v8, %v5077_v54  ;;  %v3558_v40 = vmul.f32 -1.442695, %v5213_v63  ;;  %v3890_v46 = vpop.f32.mrb[28].mxu1 }
 0x202   : > { %v4384_v2 = vpop.eup %4383  ;;  %4401 = vrcp.f32 %v2942_v44  ;;  %v2943_v35 = vadd.f32 1.0, %v4382_v4  ;;  %v5221_v18 = vadd.f32 %v4057_v59, %v5077_v54  ;;  %v4026_v56 = vpop.f32.mrb[28].mxu0 }
 0x203   : > { %v4386_v22 = vpop.eup %4385  ;;  %4403 = vrcp.f32 %v2940_v30  ;;  %v2941_v45 = vadd.f32 1.0, %v4384_v2  ;;  %v3561_v41 = vmul.f32 -1.442695, %v5217_v17  ;;  %v1563_v57 = vpop.f32.mrb[29].mxu1  ;;  %v4058_v61 = vadd.f32 %v4026_v56, %v3890_v46 }
 0x204   : > { %v4388_v36 = vpop.eup %4387  ;;  %v3034_v37 = vmul.f32 %v4386_v22, %v5132_v43  ;;  %4405 = vrcp.f32 %v2943_v35  ;;  %v3559_v21 = vmul.f32 -1.442695, %v5221_v18  ;;  %v2742_v1 = vpop.f32.mrb[29].mxu0 }
 0x205   : > { %v4390_v58 = vpop.eup %4389  ;;  %v3032_v39 = vmul.f32 %v4388_v36, %v5136_v11  ;;  %4407 = vrcp.f32 %v2941_v45  ;;  %v3891_v24 = vpop.f32.mrb[30].mxu1  ;;  %v4059_v53 = vadd.f32 %v2742_v1, %v1563_v57  ;;  %v5233_v26 = vadd.f32 %v4058_v61, %v5077_v54 }
 0x206   : > { %v4392_v10 = vpop.eup %4391  ;;  %3066 = vst [vmem:[%s5146_s19 + $0x70] sm:$0xff] %v3034_v37  ;;  %v3035_v43 = vmul.f32 %v4390_v58, %v5141_v20  ;;  %4409 = vpow2.f32 %v3560_v34  ;;  %v4027_v31 = vpop.f32.mrb[30].mxu0 }
 0x207   : > { %v1566_v15 = vpop.f32.mrb[31].mxu1  ;;  %v4394_v19 = vpop.eup %4393  ;;  %3064 = vst [vmem:[%s5146_s19 + $0x60] sm:$0xff] %v3032_v39  ;;  %v3033_v11 = vmul.f32 %v4392_v10, %v5150_v23  ;;  %4411 = vpow2.f32 %v3558_v40  ;;  %v4060_v32 = vadd.f32 %v4027_v31, %v3891_v24  ;;  %v5237_v20 = vadd.f32 %v4059_v53, %v5077_v54 }
 0x208   : > { %v2745_v47 = vpop.f32.mrb[31].mxu0  ;;  %v4396_v38 = vpop.eup %4395  ;;  %3067 = vst [vmem:[%s5146_s19 + $0x78] sm:$0xff] %v3035_v43  ;;  %v2946_v48 = vadd.f32 1.0, %v4394_v19  ;;  %4413 = vpow2.f32 %v3561_v41  ;;  %v3564_v14 = vmul.f32 -1.442695, %v5233_v26 }
 0x209   : > { %v4061_v50 = vadd.f32 %v2745_v47, %v1566_v15  ;;  %v4398_v60 = vpop.eup %4397  ;;  %3065 = vst [vmem:[%s5146_s19 + $0x68] sm:$0xff] %v3033_v11  ;;  %v2944_v62 = vadd.f32 1.0, %v4396_v38  ;;  %4415 = vpow2.f32 %v3559_v21  ;;  %v5241_v23 = vadd.f32 %v4060_v32, %v5077_v54 }
 0x20a   : > { %v4400_v0 = vpop.eup %4399  ;;  %4417 = vrcp.f32 %v2946_v48  ;;  %v2947_v12 = vadd.f32 1.0, %v4398_v60  ;;  %v3562_v29 = vmul.f32 -1.442695, %v5237_v20 }
 0x20b   : > { %v5245_v16 = vadd.f32 %v4061_v50, %v5077_v54  ;;  %4419 = vrcp.f32 %v2944_v62  ;;  %v2945_v27 = vadd.f32 1.0, %v4400_v0  ;;  %v3565_v6 = vmul.f32 -1.442695, %v5241_v23 }
 0x20c   : > { %v4402_v5 = vpop.eup %4401  ;;  %4421 = vrcp.f32 %v2947_v12 }
 0x20d   : > { %v4404_v7 = vpop.eup %4403  ;;  %v3038_v8 = vmul.f32 %v4402_v5, %v5162_v33  ;;  %4423 = vrcp.f32 %v2945_v27  ;;  %v3563_v25 = vmul.f32 -1.442695, %v5245_v16 }
 0x20e   : > { %v4406_v28 = vpop.eup %4405  ;;  %v3036_v54 = vmul.f32 %v4404_v7, %v5166_v51  ;;  %4425 = vpow2.f32 %v3564_v14 }
 0x20f   : > { %v4408_v44 = vpop.eup %4407  ;;  %3070 = vst [vmem:[%s5146_s19 + $0x90] sm:$0xff] %v3038_v8  ;;  %v3039_v59 = vmul.f32 %v4406_v28, %v5170_v13  ;;  %4427 = vpow2.f32 %v3562_v29 }
 0x210   : > { %v4410_v4 = vpop.eup %4409  ;;  %3068 = vst [vmem:[%s5146_s19 + $0x80] sm:$0xff] %v3036_v54  ;;  %v3037_v30 = vmul.f32 %v4408_v44, %v5174_v52  ;;  %4429 = vpow2.f32 %v3565_v6 }
 0x211   : > { %v4412_v2 = vpop.eup %4411  ;;  %3071 = vst [vmem:[%s5146_s19 + $0x98] sm:$0xff] %v3039_v59  ;;  %v2950_v33 = vadd.f32 1.0, %v4410_v4  ;;  %4431 = vpow2.f32 %v3563_v25 }
 0x212   : > { %v4414_v35 = vpop.eup %4413  ;;  %3069 = vst [vmem:[%s5146_s19 + $0x88] sm:$0xff] %v3037_v30  ;;  %v2948_v34 = vadd.f32 1.0, %v4412_v2 }
 0x213   : > { %v4416_v51 = vpop.eup %4415  ;;  %4433 = vrcp.f32 %v2950_v33  ;;  %v2951_v22 = vadd.f32 1.0, %v4414_v35 }
 0x214   : > { %v4418_v45 = vpop.eup %4417  ;;  %4435 = vrcp.f32 %v2948_v34  ;;  %v2949_v13 = vadd.f32 1.0, %v4416_v51 }
 0x215   : > { %v4420_v40 = vpop.eup %4419  ;;  %v3042_v52 = vmul.f32 %v4418_v45, %v5186_v42  ;;  %4437 = vrcp.f32 %v2951_v22 }
 0x216   : > { %v4422_v46 = vpop.eup %4421  ;;  %v3040_v36 = vmul.f32 %v4420_v40, %v5190_v55  ;;  %4439 = vrcp.f32 %v2949_v13 }
 0x217   : > { %v4424_v37 = vpop.eup %4423  ;;  %3074 = vst [vmem:[%s5146_s19 + $0xb0] sm:$0xff] %v3042_v52  ;;  %v3043_v41 = vmul.f32 %v4422_v46, %v5194_v9 }
 0x218   : > { %v4426_v56 = vpop.eup %4425  ;;  %3072 = vst [vmem:[%s5146_s19 + $0xa0] sm:$0xff] %v3040_v36  ;;  %v3041_v57 = vmul.f32 %v4424_v37, %v5198_v3 }
 0x219   : > { %v4428_v58 = vpop.eup %4427  ;;  %3075 = vst [vmem:[%s5146_s19 + $0xb8] sm:$0xff] %v3043_v41  ;;  %v2954_v39 = vadd.f32 1.0, %v4426_v56 }
 0x21a   : > { %v4430_v21 = vpop.eup %4429  ;;  %3073 = vst [vmem:[%s5146_s19 + $0xa8] sm:$0xff] %v3041_v57  ;;  %v2952_v42 = vadd.f32 1.0, %v4428_v58 }
 0x21b   : > { %v4432_v61 = vpop.eup %4431  ;;  %4441 = vrcp.f32 %v2954_v39  ;;  %v2955_v55 = vadd.f32 1.0, %v4430_v21 }
 0x21c   : > { %4443 = vrcp.f32 %v2952_v42  ;;  %v2953_v1 = vadd.f32 1.0, %v4432_v61 }
 0x21d   : > { %v4434_v9 = vpop.eup %4433  ;;  %4445 = vrcp.f32 %v2955_v55 }
 0x21e   : > { %v4436_v24 = vpop.eup %4435  ;;  %v3046_v3 = vmul.f32 %v4434_v9, %v5209_v49  ;;  %4447 = vrcp.f32 %v2953_v1 }
 0x21f   : > { %v4438_v10 = vpop.eup %4437  ;;  %v3044_v43 = vmul.f32 %v4436_v24, %v5213_v63 }
 0x220   : > { %v4440_v53 = vpop.eup %4439  ;;  %3078 = vst [vmem:[%s5146_s19 + $0xd0] sm:$0xff] %v3046_v3  ;;  %v3047_v31 = vmul.f32 %v4438_v10, %v5217_v17 }
 0x221   : > { %3076 = vst [vmem:[%s5146_s19 + $0xc0] sm:$0xff] %v3044_v43  ;;  %v3045_v15 = vmul.f32 %v4440_v53, %v5221_v18 }
 0x222   : > { %3079 = vst [vmem:[%s5146_s19 + $0xd8] sm:$0xff] %v3047_v31 }
 0x223   : > { %3077 = vst [vmem:[%s5146_s19 + $0xc8] sm:$0xff] %v3045_v15 }
 0x225   : > { %v4442_v19 = vpop.eup %4441 }
 0x226   : > { %v4444_v11 = vpop.eup %4443  ;;  %v3050_v49 = vmul.f32 %v4442_v19, %v5233_v26 }
 0x227   : > { %v4446_v32 = vpop.eup %4445  ;;  %v3048_v47 = vmul.f32 %v4444_v11, %v5237_v20 }
 0x228   : > { %v4448_v63 = vpop.eup %4447  ;;  %3082 = vst [vmem:[%s5146_s19 + $0xf0] sm:$0xff] %v3050_v49  ;;  %v3051_v38 = vmul.f32 %v4446_v32, %v5241_v23 }
 0x229   : > { %3080 = vst [vmem:[%s5146_s19 + $0xe0] sm:$0xff] %v3048_v47  ;;  %v3049_v17 = vmul.f32 %v4448_v63, %v5245_v16 }
 0x22a   : > { %3083 = vst [vmem:[%s5146_s19 + $0xf8] sm:$0xff] %v3051_v38 }
 0x22b   : > { %3081 = vst [vmem:[%s5146_s19 + $0xe8] sm:$0xff] %v3049_v17 }
 0x22c PF: > { %s13_s14 = sadd.s32 1, %s4471_s14   ;;  %s5295_s12 = smov %s4467_s13 }
 0x22d   : > { %p10_p5 = scmp.ge.s32.totalorder %s13_s14, 4   ;;  %s5296_s13 = smov %s5298_s15 }
 0x22f   :  { %12 = sbr.rel (!%p10_p5) target bundleno = 2 (0x2), region = 73 }

</bundles_post_ra>
